<compile_context>
chip_gen: v7x
topology: tpu7x:2x2x1
jax: 0.10.0
libtpu: 0.0.40
codegen_flags: <defaults>
</compile_context>

<pallas_src>
import functools

import jax
import jax.numpy as jnp
from jax.experimental import pallas as pl
from jax.experimental.pallas import tpu as pltpu


def _pcae_kernel(xy_ref, mask_ref,
                 w1_ref, b1_ref,
                 w2_ref, b2_ref,
                 w3_ref, b3_ref,
                 wd1_ref, bd1_ref,
                 wd2_ref, bd2_ref,
                 wd3_ref, bd3_ref,
                 enc_ref, dec_ref):
    """Processes a tile of TB batch elements per grid step."""
    TB, N, _ = xy_ref.shape
    k = w3_ref.shape[1]

    xy = xy_ref[...].reshape(TB * N, 2)     # (TB*N, 2) flattened for big-M matmuls
    mask = mask_ref[...]                    # (TB, N, 1)

    # --- encoder layer 1 (Cin=2): two VPU FMAs, no K=2 MXU pass ---
    w1 = w1_ref[...]                        # (2, 64), BN scale already folded in
    h = xy[:, 0:1] * w1[0:1, :] + xy[:, 1:2] * w1[1:2, :]       # (TB*N, 64)
    h = jnp.maximum(h + b1_ref[...], 0.0)

    # --- encoder layers 2/3: MXU matmuls with M = TB*N (BN scale folded) ---
    h = jnp.dot(h, w2_ref[...], preferred_element_type=jnp.float32)
    h = jnp.maximum(h + b2_ref[...], 0.0)                        # (TB*N, 128)
    h = jnp.dot(h, w3_ref[...], preferred_element_type=jnp.float32)
    h = jnp.maximum(h + b3_ref[...], 0.0)                        # (TB*N, k)

    # --- masked global max-pool over points ---
    h = h.reshape(TB, N, k)
    # mask > 0.5 instead of == 1.0 (robust to non-exact float masks; same result
    # for {0,1} masks).  Fully-masked samples still yield -inf, like PyTorch.
    masked = jnp.where(mask > 0.5, h, -jnp.inf)
    enc = jnp.max(masked, axis=1)                                # (TB, k)
    enc_ref[...] = enc

    # --- decoder, batched over the whole tile (M = TB, not 1) ---
    d = jnp.dot(enc, wd1_ref[...], preferred_element_type=jnp.float32)
    d = jnp.maximum(d + bd1_ref[...], 0.0)                       # (TB, 256)
    d = jnp.dot(d, wd2_ref[...], preferred_element_type=jnp.float32)
    d = jnp.maximum(d + bd2_ref[...], 0.0)                       # (TB, 256)
    d = jnp.dot(d, wd3_ref[...], preferred_element_type=jnp.float32) + bd3_ref[...]
    dec_ref[...] = jnp.maximum(d, 0.0)                           # (TB, 2*num_points)


def _pick_batch_tile(B, N, k, budget_bytes=12 * 1024 * 1024):
    """Batch-tile size: multiple of 8, capped so f32 encoder activations fit a
    modest VMEM budget (keeps the same TB valid on v5e/v6e/v7x)."""
    per_elem = N * (3 + 64 + 128 + k) * 4          # input + activation bytes / element
    tb = max(8, min(256, (budget_bytes // per_elem) // 8 * 8))
    b_pad8 = ((B + 7) // 8) * 8
    return min(tb, b_pad8)


def init_params(key, k, num_points):
    """Deterministic xavier-uniform-style weights + BN params (eval mode)."""
    def xavier(key, cin, cout):
        bound = (6.0 / (cin + cout)) ** 0.5
        return jax.random.uniform(key, (cin, cout), jnp.float32, -bound, bound)

    def bn(key, c, eps=1e-5):
        kg, kb, km, kv = jax.random.split(key, 4)
        gamma = jax.random.uniform(kg, (1, c), jnp.float32, 0.5, 1.5)
        beta = jax.random.uniform(kb, (1, c), jnp.float32, -0.1, 0.1)
        mean = jax.random.uniform(km, (1, c), jnp.float32, -0.1, 0.1)
        var = jax.random.uniform(kv, (1, c), jnp.float32, 0.5, 1.5)
        scale = gamma / jnp.sqrt(var + eps)
        shift = beta - mean * scale
        return scale, shift

    keys = jax.random.split(key, 12)
    w1 = xavier(keys[0], 2, 64)
    s1, b1 = bn(keys[1], 64)
    w2 = xavier(keys[2], 64, 128)
    s2, b2 = bn(keys[3], 128)
    w3 = xavier(keys[4], 128, k)
    s3, b3 = bn(keys[5], k)
    wd1 = xavier(keys[6], k, 256)
    sd1, bd1 = bn(keys[7], 256)
    wd2 = xavier(keys[8], 256, 256)
    sd2, bd2 = bn(keys[9], 256)
    wd3 = xavier(keys[10], 256, num_points * 2)
    bd3 = jax.random.uniform(keys[11], (1, num_points * 2), jnp.float32, -0.05, 0.05)
    return (w1, s1, b1, w2, s2, b2, w3, s3, b3,
            wd1, sd1, bd1, wd2, sd2, bd2, wd3, bd3)


@functools.partial(jax.jit, static_argnames=("k", "num_points"))
def pcae_forward(x, params, *, k, num_points):
    """x: (B, 3, N) float32 (PyTorch NCW layout).  Returns (encoded, decoded)."""
    B, _, N = x.shape
    x_t = jnp.transpose(x, (0, 2, 1)).astype(jnp.float32)   # (B, N, 3) channels-last
    xy = x_t[:, :, 0:2]                                       # (B, N, 2)
    mask = x_t[:, :, 2:3]                                     # (B, N, 1)

    # Fold the eval-mode BatchNorm scale into the conv weights (per-output-channel),
    # leaving only the shift as a post-matmul add in the kernel.
    (w1, s1, b1, w2, s2, b2, w3, s3, b3,
     wd1, sd1, bd1, wd2, sd2, bd2, wd3, bd3) = params
    kparams = (w1 * s1, b1, w2 * s2, b2, w3 * s3, b3,
               wd1 * sd1, bd1, wd2 * sd2, bd2, wd3, bd3)

    # Batch tiling: TB elements per grid step; pad B to a multiple of TB.
    tb = _pick_batch_tile(B, N, k)
    b_pad = ((B + tb - 1) // tb) * tb
    if b_pad != B:
        pad = b_pad - B
        xy = jnp.pad(xy, ((0, pad), (0, 0), (0, 0)))
        # Pad mask with 1.0 so padded rows stay finite (avoids -inf/NaN in dead rows).
        mask = jnp.pad(mask, ((0, pad), (0, 0), (0, 0)), constant_values=1.0)

    two_p = 2 * num_points
    weight_spec = lambda arr: pl.BlockSpec(arr.shape, lambda b: (0,) * arr.ndim)

    in_specs = [
        pl.BlockSpec((tb, N, 2), lambda b: (b, 0, 0)),
        pl.BlockSpec((tb, N, 1), lambda b: (b, 0, 0)),
    ] + [weight_spec(p) for p in kparams]

    out_specs = (
        pl.BlockSpec((tb, k), lambda b: (b, 0)),
        pl.BlockSpec((tb, two_p), lambda b: (b, 0)),
    )
    out_shape = (
        jax.ShapeDtypeStruct((b_pad, k), jnp.float32),
        jax.ShapeDtypeStruct((b_pad, two_p), jnp.float32),
    )

    # Explicit VMEM budget: double-buffered input tiles + f32 activations +
    # (double-buffered) weights + output tiles, clamped to a range that is
    # safe on v5e (16 MiB scoped default) through v7x (64 MiB physical).
    weight_bytes = sum(int(p.size) * 4 for p in kparams)
    est = (2 * 2 * tb * N * 3 * 4
           + tb * N * (64 + 128 + k) * 4
           + 2 * weight_bytes
           + 2 * 2 * tb * (k + two_p) * 4)
    vmem_limit = int(min(48 * 1024 * 1024, max(16 * 1024 * 1024, 2 * est)))

    enc2d, dec2d = pl.pallas_call(
        _pcae_kernel,
        grid=(b_pad // tb,),
        in_specs=in_specs,
        out_specs=out_specs,
        out_shape=out_shape,
        compiler_params=pltpu.CompilerParams(
            dimension_semantics=("parallel",),
            vmem_limit_bytes=vmem_limit),
    )(xy, mask, *kparams)

    enc2d = enc2d[:B]
    dec2d = dec2d[:B]
    encoded = enc2d[:, :, None]                    # (B, k, 1) — matches torch maxpool output
    decoded = dec2d.reshape(B, 2, num_points)      # matches torch .view(b, 2, num_points)
    return encoded, decoded


def pcae_reference(x, params, *, k, num_points):
    """Pure-JAX reference of the same forward pass (for correctness check)."""
    (w1, s1, b1, w2, s2, b2, w3, s3, b3,
     wd1, sd1, bd1, wd2, sd2, bd2, wd3, bd3) = params
    B = x.shape[0]
    x_t = jnp.transpose(x, (0, 2, 1))
    xy, mask = x_t[:, :, 0:2], x_t[:, :, 2:3]
    h = jnp.maximum(xy @ w1 * s1 + b1, 0.0)
    h = jnp.maximum(h @ w2 * s2 + b2, 0.0)
    h = jnp.maximum(h @ w3 * s3 + b3, 0.0)
    enc = jnp.max(jnp.where(mask == 1.0, h, -jnp.inf), axis=1)   # (B, k)
    d = jnp.maximum(enc @ wd1 * sd1 + bd1, 0.0)
    d = jnp.maximum(d @ wd2 * sd2 + bd2, 0.0)
    d = jnp.maximum(d @ wd3 + bd3, 0.0)
    return enc[:, :, None], d.reshape(B, 2, num_points)


if __name__ == "__main__":
    B, N = 2, 16           # batch, number of input points
    k, num_points = 32, 8  # representation dim, decoded points

    key = jax.random.PRNGKey(0)
    kx, kp = jax.random.split(key, 2)

    coords = jax.random.normal(kx, (B, 2, N), jnp.float32)
    # mask: first 12 points valid, rest padded (at least one valid point per batch)
    mask = (jnp.arange(N)[None, None, :] < 12).astype(jnp.float32)
    mask = jnp.broadcast_to(mask, (B, 1, N))
    x = jnp.concatenate([coords, mask], axis=1)   # (B, 3, N) — PyTorch NCW input

    params = init_params(kp, k, num_points)

    encoded, decoded = pcae_forward(x, params, k=k, num_points=num_points)
    jax.block_until_ready((encoded, decoded))

    enc_ref, dec_ref = pcae_reference(x, params, k=k, num_points=num_points)
    assert encoded.shape == (B, k, 1) and decoded.shape == (B, 2, num_points)
    assert jnp.allclose(encoded, enc_ref, atol=1e-4, rtol=1e-4)
    assert jnp.allclose(decoded, dec_ref, atol=1e-4, rtol=1e-4)

    print("KERNEL_OK")
</pallas_src>

<mosaic_0001>
module attributes {stable_mosaic.version = 11 : i64} {
  func.func @_pcae_kernel(%arg0: i32, %arg1: memref<8x16x2xf32, #tpu.memory_space<vmem>>, %arg2: memref<8x16x1xf32, #tpu.memory_space<vmem>>, %arg3: memref<2x64xf32, #tpu.memory_space<vmem>>, %arg4: memref<1x64xf32, #tpu.memory_space<vmem>>, %arg5: memref<64x128xf32, #tpu.memory_space<vmem>>, %arg6: memref<1x128xf32, #tpu.memory_space<vmem>>, %arg7: memref<128x32xf32, #tpu.memory_space<vmem>>, %arg8: memref<1x32xf32, #tpu.memory_space<vmem>>, %arg9: memref<32x256xf32, #tpu.memory_space<vmem>>, %arg10: memref<1x256xf32, #tpu.memory_space<vmem>>, %arg11: memref<256x256xf32, #tpu.memory_space<vmem>>, %arg12: memref<1x256xf32, #tpu.memory_space<vmem>>, %arg13: memref<256x16xf32, #tpu.memory_space<vmem>>, %arg14: memref<1x16xf32, #tpu.memory_space<vmem>>, %arg15: memref<8x32xf32, #tpu.memory_space<vmem>>, %arg16: memref<8x16xf32, #tpu.memory_space<vmem>>) attributes {dimension_semantics = [#tpu.dimension_semantics<parallel>], iteration_bounds = array<i64: 1>, scalar_prefetch = 0 : i64, scratch_operands = 0 : i64, tpu.core_type = #tpu.core_type<tc>, window_params = [{transform_indices = @transform_0, window_bounds = array<i64: 8, 16, 2>}, {transform_indices = @transform_1, window_bounds = array<i64: 8, 16, 1>}, {pipeline_mode = #tpu.pipeline_mode<synchronous>, transform_indices = @transform_2, window_bounds = array<i64: 2, 64>}, {pipeline_mode = #tpu.pipeline_mode<synchronous>, transform_indices = @transform_3, window_bounds = array<i64: 1, 64>}, {pipeline_mode = #tpu.pipeline_mode<synchronous>, transform_indices = @transform_4, window_bounds = array<i64: 64, 128>}, {pipeline_mode = #tpu.pipeline_mode<synchronous>, transform_indices = @transform_5, window_bounds = array<i64: 1, 128>}, {pipeline_mode = #tpu.pipeline_mode<synchronous>, transform_indices = @transform_6, window_bounds = array<i64: 128, 32>}, {pipeline_mode = #tpu.pipeline_mode<synchronous>, transform_indices = @transform_7, window_bounds = array<i64: 1, 32>}, {pipeline_mode = #tpu.pipeline_mode<synchronous>, transform_indices = @transform_8, window_bounds = array<i64: 32, 256>}, {pipeline_mode = #tpu.pipeline_mode<synchronous>, transform_indices = @transform_9, window_bounds = array<i64: 1, 256>}, {pipeline_mode = #tpu.pipeline_mode<synchronous>, transform_indices = @transform_10, window_bounds = array<i64: 256, 256>}, {pipeline_mode = #tpu.pipeline_mode<synchronous>, transform_indices = @transform_11, window_bounds = array<i64: 1, 256>}, {pipeline_mode = #tpu.pipeline_mode<synchronous>, transform_indices = @transform_12, window_bounds = array<i64: 256, 16>}, {pipeline_mode = #tpu.pipeline_mode<synchronous>, transform_indices = @transform_13, window_bounds = array<i64: 1, 16>}, {transform_indices = @transform_14, window_bounds = array<i64: 8, 32>}, {transform_indices = @transform_15, window_bounds = array<i64: 8, 16>}]} {
    %c0 = arith.constant 0 : index
    %c0_0 = arith.constant 0 : index
    %c0_1 = arith.constant 0 : index
    %0 = vector.load %arg1[%c0, %c0_0, %c0_1] : memref<8x16x2xf32, #tpu.memory_space<vmem>>, vector<8x16x2xf32>
    %1 = vector.shape_cast %0 : vector<8x16x2xf32> to vector<128x2xf32>
    %c0_2 = arith.constant 0 : index
    %c0_3 = arith.constant 0 : index
    %c0_4 = arith.constant 0 : index
    %2 = vector.load %arg2[%c0_2, %c0_3, %c0_4] : memref<8x16x1xf32, #tpu.memory_space<vmem>>, vector<8x16x1xf32>
    %c0_5 = arith.constant 0 : index
    %c0_6 = arith.constant 0 : index
    %3 = vector.load %arg3[%c0_5, %c0_6] : memref<2x64xf32, #tpu.memory_space<vmem>>, vector<2x64xf32>
    %4 = vector.extract_strided_slice %1 {offsets = [0, 0], sizes = [128, 1], strides = [1, 1]} : vector<128x2xf32> to vector<128x1xf32>
    %5 = vector.extract_strided_slice %3 {offsets = [0, 0], sizes = [1, 64], strides = [1, 1]} : vector<2x64xf32> to vector<1x64xf32>
    %6 = vector.broadcast %4 : vector<128x1xf32> to vector<128x64xf32>
    %7 = vector.broadcast %5 : vector<1x64xf32> to vector<128x64xf32>
    %8 = arith.mulf %6, %7 : vector<128x64xf32>
    %9 = vector.extract_strided_slice %1 {offsets = [0, 1], sizes = [128, 1], strides = [1, 1]} : vector<128x2xf32> to vector<128x1xf32>
    %10 = vector.extract_strided_slice %3 {offsets = [1, 0], sizes = [1, 64], strides = [1, 1]} : vector<2x64xf32> to vector<1x64xf32>
    %11 = vector.broadcast %9 : vector<128x1xf32> to vector<128x64xf32>
    %12 = vector.broadcast %10 : vector<1x64xf32> to vector<128x64xf32>
    %13 = arith.mulf %11, %12 : vector<128x64xf32>
    %14 = arith.addf %8, %13 : vector<128x64xf32>
    %c0_7 = arith.constant 0 : index
    %c0_8 = arith.constant 0 : index
    %15 = vector.load %arg4[%c0_7, %c0_8] : memref<1x64xf32, #tpu.memory_space<vmem>>, vector<1x64xf32>
    %16 = vector.broadcast %15 : vector<1x64xf32> to vector<128x64xf32>
    %17 = arith.addf %14, %16 : vector<128x64xf32>
    %cst = arith.constant 0.000000e+00 : f32
    %18 = vector.broadcast %cst : f32 to vector<128x64xf32>
    %19 = arith.maximumf %17, %18 : vector<128x64xf32>
    %c0_9 = arith.constant 0 : index
    %c0_10 = arith.constant 0 : index
    %20 = vector.load %arg5[%c0_9, %c0_10] : memref<64x128xf32, #tpu.memory_space<vmem>>, vector<64x128xf32>
    %cst_11 = arith.constant dense<0.000000e+00> : vector<128x128xf32>
    %21 = tpu.matmul %19, %20, %cst_11 {dimension_numbers = #tpu.dot_dimension_numbers<[1], [0], [0], [1], [0, 0, 1, 1], [], []>} : vector<128x64xf32>, vector<64x128xf32>, vector<128x128xf32> -> vector<128x128xf32>
    %c0_12 = arith.constant 0 : index
    %c0_13 = arith.constant 0 : index
    %22 = vector.load %arg6[%c0_12, %c0_13] : memref<1x128xf32, #tpu.memory_space<vmem>>, vector<1x128xf32>
    %23 = vector.broadcast %22 : vector<1x128xf32> to vector<128x128xf32>
    %24 = arith.addf %21, %23 : vector<128x128xf32>
    %cst_14 = arith.constant 0.000000e+00 : f32
    %25 = vector.broadcast %cst_14 : f32 to vector<128x128xf32>
    %26 = arith.maximumf %24, %25 : vector<128x128xf32>
    %c0_15 = arith.constant 0 : index
    %c0_16 = arith.constant 0 : index
    %27 = vector.load %arg7[%c0_15, %c0_16] : memref<128x32xf32, #tpu.memory_space<vmem>>, vector<128x32xf32>
    %cst_17 = arith.constant dense<0.000000e+00> : vector<128x32xf32>
    %28 = tpu.matmul %26, %27, %cst_17 {dimension_numbers = #tpu.dot_dimension_numbers<[1], [0], [0], [1], [0, 0, 1, 1], [], []>} : vector<128x128xf32>, vector<128x32xf32>, vector<128x32xf32> -> vector<128x32xf32>
    %c0_18 = arith.constant 0 : index
    %c0_19 = arith.constant 0 : index
    %29 = vector.load %arg8[%c0_18, %c0_19] : memref<1x32xf32, #tpu.memory_space<vmem>>, vector<1x32xf32>
    %30 = vector.broadcast %29 : vector<1x32xf32> to vector<128x32xf32>
    %31 = arith.addf %28, %30 : vector<128x32xf32>
    %cst_20 = arith.constant 0.000000e+00 : f32
    %32 = vector.broadcast %cst_20 : f32 to vector<128x32xf32>
    %33 = arith.maximumf %31, %32 : vector<128x32xf32>
    %34 = vector.shape_cast %33 : vector<128x32xf32> to vector<8x16x32xf32>
    %cst_21 = arith.constant 5.000000e-01 : f32
    %35 = vector.broadcast %cst_21 : f32 to vector<8x16x1xf32>
    %36 = arith.cmpf ogt, %2, %35 : vector<8x16x1xf32>
    %cst_22 = arith.constant 0xFF800000 : f32
    %37 = vector.shape_cast %36 : vector<8x16x1xi1> to vector<8x16x1xi1>
    %38 = vector.broadcast %37 : vector<8x16x1xi1> to vector<8x16x32xi1>
    %39 = vector.broadcast %cst_22 : f32 to vector<8x16x32xf32>
    %40 = arith.select %38, %34, %39 : vector<8x16x32xi1>, vector<8x16x32xf32>
    %cst_23 = arith.constant dense<0xFF800000> : vector<8x32xf32>
    %41 = vector.multi_reduction <maximumf>, %40, %cst_23 [1] : vector<8x16x32xf32> to vector<8x32xf32>
    %c0_24 = arith.constant 0 : index
    %c0_25 = arith.constant 0 : index
    %42 = vector.load %arg15[%c0_24, %c0_25] : memref<8x32xf32, #tpu.memory_space<vmem>>, vector<8x32xf32>
    tpu.vector_store %arg15[%c0_24, %c0_25], %41 {strides = array<i32>} : memref<8x32xf32, #tpu.memory_space<vmem>>, vector<8x32xf32>,
    %c0_26 = arith.constant 0 : index
    %c0_27 = arith.constant 0 : index
    %43 = vector.load %arg9[%c0_26, %c0_27] : memref<32x256xf32, #tpu.memory_space<vmem>>, vector<32x256xf32>
    %cst_28 = arith.constant dense<0.000000e+00> : vector<8x256xf32>
    %44 = tpu.matmul %41, %43, %cst_28 {dimension_numbers = #tpu.dot_dimension_numbers<[1], [0], [0], [1], [0, 0, 1, 1], [], []>} : vector<8x32xf32>, vector<32x256xf32>, vector<8x256xf32> -> vector<8x256xf32>
    %c0_29 = arith.constant 0 : index
    %c0_30 = arith.constant 0 : index
    %45 = vector.load %arg10[%c0_29, %c0_30] : memref<1x256xf32, #tpu.memory_space<vmem>>, vector<1x256xf32>
    %46 = vector.broadcast %45 : vector<1x256xf32> to vector<8x256xf32>
    %47 = arith.addf %44, %46 : vector<8x256xf32>
    %cst_31 = arith.constant 0.000000e+00 : f32
    %48 = vector.broadcast %cst_31 : f32 to vector<8x256xf32>
    %49 = arith.maximumf %47, %48 : vector<8x256xf32>
    %c0_32 = arith.constant 0 : index
    %c0_33 = arith.constant 0 : index
    %50 = vector.load %arg11[%c0_32, %c0_33] : memref<256x256xf32, #tpu.memory_space<vmem>>, vector<256x256xf32>
    %cst_34 = arith.constant dense<0.000000e+00> : vector<8x256xf32>
    %51 = tpu.matmul %49, %50, %cst_34 {dimension_numbers = #tpu.dot_dimension_numbers<[1], [0], [0], [1], [0, 0, 1, 1], [], []>} : vector<8x256xf32>, vector<256x256xf32>, vector<8x256xf32> -> vector<8x256xf32>
    %c0_35 = arith.constant 0 : index
    %c0_36 = arith.constant 0 : index
    %52 = vector.load %arg12[%c0_35, %c0_36] : memref<1x256xf32, #tpu.memory_space<vmem>>, vector<1x256xf32>
    %53 = vector.broadcast %52 : vector<1x256xf32> to vector<8x256xf32>
    %54 = arith.addf %51, %53 : vector<8x256xf32>
    %cst_37 = arith.constant 0.000000e+00 : f32
    %55 = vector.broadcast %cst_37 : f32 to vector<8x256xf32>
    %56 = arith.maximumf %54, %55 : vector<8x256xf32>
    %c0_38 = arith.constant 0 : index
    %c0_39 = arith.constant 0 : index
    %57 = vector.load %arg13[%c0_38, %c0_39] : memref<256x16xf32, #tpu.memory_space<vmem>>, vector<256x16xf32>
    %cst_40 = arith.constant dense<0.000000e+00> : vector<8x16xf32>
    %58 = tpu.matmul %56, %57, %cst_40 {dimension_numbers = #tpu.dot_dimension_numbers<[1], [0], [0], [1], [0, 0, 1, 1], [], []>} : vector<8x256xf32>, vector<256x16xf32>, vector<8x16xf32> -> vector<8x16xf32>
    %c0_41 = arith.constant 0 : index
    %c0_42 = arith.constant 0 : index
    %59 = vector.load %arg14[%c0_41, %c0_42] : memref<1x16xf32, #tpu.memory_space<vmem>>, vector<1x16xf32>
    %60 = vector.broadcast %59 : vector<1x16xf32> to vector<8x16xf32>
    %61 = arith.addf %58, %60 : vector<8x16xf32>
    %cst_43 = arith.constant 0.000000e+00 : f32
    %62 = vector.broadcast %cst_43 : f32 to vector<8x16xf32>
    %63 = arith.maximumf %61, %62 : vector<8x16xf32>
    %c0_44 = arith.constant 0 : index
    %c0_45 = arith.constant 0 : index
    %64 = vector.load %arg16[%c0_44, %c0_45] : memref<8x16xf32, #tpu.memory_space<vmem>>, vector<8x16xf32>
    tpu.vector_store %arg16[%c0_44, %c0_45], %63 {strides = array<i32>} : memref<8x16xf32, #tpu.memory_space<vmem>>, vector<8x16xf32>,
    return
  }
  func.func @transform_0(%arg0: i32) -> (i32, i32, i32) {
    %c0_i32 = arith.constant 0 : i32
    %c0_i32_0 = arith.constant 0 : i32
    %c0_i32_1 = arith.constant 0 : i32
    return %arg0, %c0_i32, %c0_i32_0 : i32, i32, i32
  }
  func.func @transform_1(%arg0: i32) -> (i32, i32, i32) {
    %c0_i32 = arith.constant 0 : i32
    %c0_i32_0 = arith.constant 0 : i32
    %c0_i32_1 = arith.constant 0 : i32
    return %arg0, %c0_i32, %c0_i32_0 : i32, i32, i32
  }
  func.func @transform_2(%arg0: i32) -> (i32, i32) {
    %c0_i32 = arith.constant 0 : i32
    %c0_i32_0 = arith.constant 0 : i32
    %c0_i32_1 = arith.constant 0 : i32
    return %c0_i32, %c0_i32_0 : i32, i32
  }
  func.func @transform_3(%arg0: i32) -> (i32, i32) {
    %c0_i32 = arith.constant 0 : i32
    %c0_i32_0 = arith.constant 0 : i32
    %c0_i32_1 = arith.constant 0 : i32
    return %c0_i32, %c0_i32_0 : i32, i32
  }
  func.func @transform_4(%arg0: i32) -> (i32, i32) {
    %c0_i32 = arith.constant 0 : i32
    %c0_i32_0 = arith.constant 0 : i32
    %c0_i32_1 = arith.constant 0 : i32
    return %c0_i32, %c0_i32_0 : i32, i32
  }
  func.func @transform_5(%arg0: i32) -> (i32, i32) {
    %c0_i32 = arith.constant 0 : i32
    %c0_i32_0 = arith.constant 0 : i32
    %c0_i32_1 = arith.constant 0 : i32
    return %c0_i32, %c0_i32_0 : i32, i32
  }
  func.func @transform_6(%arg0: i32) -> (i32, i32) {
    %c0_i32 = arith.constant 0 : i32
    %c0_i32_0 = arith.constant 0 : i32
    %c0_i32_1 = arith.constant 0 : i32
    return %c0_i32, %c0_i32_0 : i32, i32
  }
  func.func @transform_7(%arg0: i32) -> (i32, i32) {
    %c0_i32 = arith.constant 0 : i32
    %c0_i32_0 = arith.constant 0 : i32
    %c0_i32_1 = arith.constant 0 : i32
    return %c0_i32, %c0_i32_0 : i32, i32
  }
  func.func @transform_8(%arg0: i32) -> (i32, i32) {
    %c0_i32 = arith.constant 0 : i32
    %c0_i32_0 = arith.constant 0 : i32
    %c0_i32_1 = arith.constant 0 : i32
    return %c0_i32, %c0_i32_0 : i32, i32
  }
  func.func @transform_9(%arg0: i32) -> (i32, i32) {
    %c0_i32 = arith.constant 0 : i32
    %c0_i32_0 = arith.constant 0 : i32
    %c0_i32_1 = arith.constant 0 : i32
    return %c0_i32, %c0_i32_0 : i32, i32
  }
  func.func @transform_10(%arg0: i32) -> (i32, i32) {
    %c0_i32 = arith.constant 0 : i32
    %c0_i32_0 = arith.constant 0 : i32
    %c0_i32_1 = arith.constant 0 : i32
    return %c0_i32, %c0_i32_0 : i32, i32
  }
  func.func @transform_11(%arg0: i32) -> (i32, i32) {
    %c0_i32 = arith.constant 0 : i32
    %c0_i32_0 = arith.constant 0 : i32
    %c0_i32_1 = arith.constant 0 : i32
    return %c0_i32, %c0_i32_0 : i32, i32
  }
  func.func @transform_12(%arg0: i32) -> (i32, i32) {
    %c0_i32 = arith.constant 0 : i32
    %c0_i32_0 = arith.constant 0 : i32
    %c0_i32_1 = arith.constant 0 : i32
    return %c0_i32, %c0_i32_0 : i32, i32
  }
  func.func @transform_13(%arg0: i32) -> (i32, i32) {
    %c0_i32 = arith.constant 0 : i32
    %c0_i32_0 = arith.constant 0 : i32
    %c0_i32_1 = arith.constant 0 : i32
    return %c0_i32, %c0_i32_0 : i32, i32
  }
  func.func @transform_14(%arg0: i32) -> (i32, i32) {
    %c0_i32 = arith.constant 0 : i32
    %c0_i32_0 = arith.constant 0 : i32
    return %arg0, %c0_i32 : i32, i32
  }
  func.func @transform_15(%arg0: i32) -> (i32, i32) {
    %c0_i32 = arith.constant 0 : i32
    %c0_i32_0 = arith.constant 0 : i32
    return %arg0, %c0_i32 : i32, i32
  }
}

</mosaic_0001>

<bundles_post_ra>
// kernel: pcae_forward.1
= control target key start
LH: loop header
LB: loop body
LE: loop exit
PB: predicated region body
PF: predicated region fallthrough
CT: control target
= control target key end

     0   :  { %v1672_v0 = vmov 0   ;;  %v1673_v3 = vmov 1   ;;  %vm336_vm9 = vcmask 523264   ;;  %s2398_s0 = inlined_call_operand.vmem [shape: f32[8,16,2], index: 0, kind: input, shape index: {}]   ;;  %s2399_s4 = inlined_call_operand.vmem [shape: f32[64,128], index: 4, kind: input, shape index: {}]   ;;  %s2400_s1 = inlined_call_operand.vmem [shape: f32[8,16,1], index: 1, kind: input, shape index: {}]   ;;  %s2401_s6 = inlined_call_operand.vmem [shape: f32[128,32], index: 6, kind: input, shape index: {}]   ;;  %s2402_s2 = inlined_call_operand.vmem [shape: f32[2,64], index: 2, kind: input, shape index: {}]   ;;  %s2403_s3 = inlined_call_operand.vmem [shape: f32[1,64], index: 3, kind: input, shape index: {}]   ;;  %s2404_s5 = inlined_call_operand.vmem [shape: f32[1,128], index: 5, kind: input, shape index: {}]   ;;  %s2405_s8 = inlined_call_operand.vmem [shape: f32[32,256], index: 8, kind: input, shape index: {}]   ;;  %s2406_s10 = inlined_call_operand.vmem [shape: f32[256,256], index: 10, kind: input, shape index: {}]   ;;  %s2407_s7 = inlined_call_operand.vmem [shape: f32[1,32], index: 7, kind: input, shape index: {}]   ;;  %s2408_s14 = inlined_call_operand.vmem [shape: f32[8,32], index: 14, kind: output, shape index: {0}]   ;;  %s2409_s12 = inlined_call_operand.vmem [shape: f32[256,16], index: 12, kind: input, shape index: {}]   ;;  %s2410_s9 = inlined_call_operand.vmem [shape: f32[1,256], index: 9, kind: input, shape index: {}]   ;;  %s2411_s11 = inlined_call_operand.vmem [shape: f32[1,256], index: 11, kind: input, shape index: {}]   ;;  %s2412_s13 = inlined_call_operand.vmem [shape: f32[1,16], index: 13, kind: input, shape index: {}]   ;;  %s2413_s15 = inlined_call_operand.vmem [shape: f32[8,16], index: 15, kind: output, shape index: {1}]  }
   0x1   :  { %1668 = vset.pattern.permute.xlu1 %v1672_v0  ;;  %1666 = vset.pattern.permute.xlu0 %v1672_v0  ;;  %v50_v1 = vld [vmem:[%s2398_s0 + $0x8] sm:$0xff]  ;;  %v49_v2 = vld [vmem:[%s2398_s0] sm:$0xff]  ;;  %v51_v4 = vld [vmem:[%s2398_s0 + $0x10] sm:$0xff] }
   0x2   :  { %89 = vperm.xlu1 %1668, %v50_v1   ;;  %84 = vperm.xlu0 %1666, %v49_v2   ;;  %v321_v5 = vld [vmem:[%s2399_s4] sm:$0xff]  ;;  %v322_v6 = vld [vmem:[%s2399_s4 + $0x8] sm:$0xff]  ;;  %v323_v8 = vld [vmem:[%s2399_s4 + $0x10] sm:$0xff] }
   0x3   :  { %v1511_v7 = vpack.c.bf16 %v322_v6, %v321_v5  ;;  %v52_v9 = vld [vmem:[%s2398_s0 + $0x18] sm:$0xff]  ;;  %v325_v11 = vld [vmem:[%s2399_s4 + $0x20] sm:$0xff]  ;;  %v326_v13 = vld [vmem:[%s2399_s4 + $0x28] sm:$0xff] }
   0x4   :  { %v324_v10 = vld [vmem:[%s2399_s4 + $0x18] sm:$0xff]  ;;  %v1519_v14 = vpack.c.bf16 %v326_v13, %v325_v11  ;;  %v53_v15 = vld [vmem:[%s2398_s0 + $0x20] sm:$0xff]  ;;  %v327_v16 = vld [vmem:[%s2399_s4 + $0x30] sm:$0xff] }
   0x5   :  { %1512 = vmatprep.subr.bf16.mxu0 %v1511_v7  ;;  %v1515_v12 = vpack.c.bf16 %v324_v10, %v323_v8  ;;  %v328_v17 = vld [vmem:[%s2399_s4 + $0x38] sm:$0xff]  ;;  %v54_v19 = vld [vmem:[%s2398_s0 + $0x28] sm:$0xff]  ;;  %v55_v20 = vld [vmem:[%s2398_s0 + $0x30] sm:$0xff] }
   0x6   :  { %1669 = vset.pattern.permute.xlu1 %v1673_v3  ;;  %1667 = vset.pattern.permute.xlu0 %v1673_v3  ;;  %v1523_v18 = vpack.c.bf16 %v328_v17, %v327_v16  ;;  %v56_v21 = vld [vmem:[%s2398_s0 + $0x38] sm:$0xff]  ;;  %v57_v22 = vld [vmem:[%s2398_s0 + $0x40] sm:$0xff]  ;;  %v58_v23 = vld [vmem:[%s2398_s0 + $0x48] sm:$0xff]  ;;  %v162_v3 = vlaneseq }
   0x7   :  { %187 = vperm.xlu1 %1669, %v50_v1   ;;  %183 = vperm.xlu0 %1667, %v49_v2   ;;  %v59_v24 = vld [vmem:[%s2398_s0 + $0x50] sm:$0xff]  ;;  %v60_v25 = vld [vmem:[%s2398_s0 + $0x58] sm:$0xff]  ;;  %v61_v26 = vld [vmem:[%s2398_s0 + $0x60] sm:$0xff] }
   0x8   :  { %1514 = vmatpush3.bf16.msra.mxu0 %v1511_v7  ;;  %v62_v27 = vld [vmem:[%s2398_s0 + $0x68] sm:$0xff]  ;;  %v63_v28 = vld [vmem:[%s2398_s0 + $0x70] sm:$0xff]  ;;  %v65_v29 = vld [vmem:[%s2400_s1] sm:$0xff]  ;;  %v163_v7 = vshrl.u32 %v162_v3, 7 }
   0x9   :  { %1516 = vmatprep.subr.bf16.mxu0 %v1515_v12  ;;  %v64_v30 = vld [vmem:[%s2398_s0 + $0x78] sm:$0xff]  ;;  %vm730_vm0 = vcmp.gt.f32.partialorder %v65_v29, 0.5  ;;  %v67_v31 = vld [vmem:[%s2400_s1 + $0x10] sm:$0xff]  ;;  %v70_v35 = vld [vmem:[%s2400_s1 + $0x28] sm:$0xff] }
   0xa   :  { %v746_v32 = vsel %vm730_vm0, 1, %v1672_v0  ;;  %vm732_vm1 = vcmp.gt.f32.partialorder %v67_v31, 0.5  ;;  %v68_v33 = vld [vmem:[%s2400_s1 + $0x18] sm:$0xff]  ;;  %vm735_vm3 = vcmp.gt.f32.partialorder %v70_v35, 0.5  ;;  %v74_v39 = vld [vmem:[%s2400_s1 + $0x48] sm:$0xff]  ;;  %v546_v48 = vld [vmem:[%s2401_s6] sm:$0xff] }
   0xb   :  { %1670 = vset.pattern.permute.xlu1 %v1672_v0  ;;  %191 = vperm.xlu0 %1667, %v51_v4   ;;  %v748_v34 = vsel %vm732_vm1, 1, %v1672_v0  ;;  %vm733_vm2 = vcmp.gt.f32.partialorder %v68_v33, 0.5  ;;  %v72_v37 = vld [vmem:[%s2400_s1 + $0x38] sm:$0xff]  ;;  %v751_v38 = vsel %vm735_vm3, 1, %v1672_v0  ;;  %vm739_vm5 = vcmp.gt.f32.partialorder %v74_v39, 0.5  ;;  %v78_v43 = vld [vmem:[%s2400_s1 + $0x68] sm:$0xff] }
   0xc   :  { %94 = vperm.xlu1 %1670, %v51_v4   ;;  %1518 = vmatpush3.bf16.msra.mxu0 %v1515_v12  ;;  %v749_v36 = vsel %vm733_vm2, 1, %v1672_v0  ;;  %vm737_vm4 = vcmp.gt.f32.partialorder %v72_v37, 0.5  ;;  %v76_v41 = vld [vmem:[%s2400_s1 + $0x58] sm:$0xff]  ;;  %v755_v42 = vsel %vm739_vm5, 1, %v1672_v0  ;;  %vm743_vm7 = vcmp.gt.f32.partialorder %v78_v43, 0.5  ;;  %v547_v49 = vld [vmem:[%s2401_s6 + $0x8] sm:$0xff] }
   0xd   :  { %1520 = vmatprep.subr.bf16.mxu0 %v1519_v14  ;;  %v753_v40 = vsel %vm737_vm4, 1, %v1672_v0  ;;  %vm741_vm6 = vcmp.gt.f32.partialorder %v76_v41, 0.5  ;;  %v80_v45 = vld [vmem:[%s2400_s1 + $0x78] sm:$0xff]  ;;  %v759_v46 = vsel %vm743_vm7, 1, %v1672_v0  ;;  %v548_v50 = vld [vmem:[%s2401_s6 + $0x10] sm:$0xff]  ;;  %v1527_v51 = vpack.c.bf16 %v547_v49, %v546_v48  ;;  %v550_v54 = vld [vmem:[%s2401_s6 + $0x20] sm:$0xff] }
   0xe   :  { %v757_v44 = vsel %vm741_vm6, 1, %v1672_v0  ;;  %vm745_vm8 = vcmp.gt.f32.partialorder %v80_v45, 0.5  ;;  %v549_v52 = vld [vmem:[%s2401_s6 + $0x18] sm:$0xff]  ;;  %v551_v55 = vld [vmem:[%s2401_s6 + $0x28] sm:$0xff]  ;;  %v552_v57 = vld [vmem:[%s2401_s6 + $0x30] sm:$0xff]  ;;  %v1909_v8 = vsub.s32 0, %v163_v7 }
   0xf   :  { %195 = vperm.xlu0 %1667, %v52_v9   ;;  %v761_v47 = vsel %vm745_vm8, 1, %v1672_v0  ;;  %v1531_v53 = vpack.c.bf16 %v549_v52, %v548_v50  ;;  %1528 = vmatprep.subr.bf16.mxu1 %v1527_v51  ;;  %v1535_v56 = vpack.c.bf16 %v551_v55, %v550_v54  ;;  %v553_v58 = vld [vmem:[%s2401_s6 + $0x38] sm:$0xff]  ;;  %v554_v60 = vld [vmem:[%s2401_s6 + $0x40] sm:$0xff]  ;;  %v555_v61 = vld [vmem:[%s2401_s6 + $0x48] sm:$0xff]  ;;  %vm842_vm2 = vcmask 261120  }
  0x10   :  { %99 = vperm.xlu1 %1670, %v52_v9   ;;  %1522 = vmatpush3.bf16.msra.mxu0 %v1519_v14  ;;  %v1539_v59 = vpack.c.bf16 %v553_v58, %v552_v57  ;;  %v1543_v62 = vpack.c.bf16 %v555_v61, %v554_v60  ;;  %v556_v63 = vld [vmem:[%s2401_s6 + $0x50] sm:$0xff]  ;;  %v557_v1 = vld [vmem:[%s2401_s6 + $0x58] sm:$0xff]  ;;  %v558_v4 = vld [vmem:[%s2401_s6 + $0x60] sm:$0xff]  ;;  %v1911_v9 = vsub.s32 1, %v163_v7 }
  0x11   :  { %1524 = vmatprep.subr.bf16.mxu0 %v1523_v18  ;;  %1530 = vmatpush3.bf16.msra.mxu1 %v1527_v51  ;;  %v1547_v2 = vpack.c.bf16 %v557_v1, %v556_v63  ;;  %v559_v5 = vld [vmem:[%s2401_s6 + $0x68] sm:$0xff]  ;;  %v81_v10 = vld [vmem:[%s2402_s2] sm:$0x3] }
  0x12   :  { %1532 = vmatprep.subr.bf16.mxu1 %v1531_v53  ;;  %v1551_v6 = vpack.c.bf16 %v559_v5, %v558_v4  ;;  %v1917_v13 = vrot.slane %v81_v10, %v1909_v8  ;;  %v1920_v14 = vrot.slane %v81_v10, %v1911_v9 }
  0x13   :  { %199 = vperm.xlu0 %1667, %v53_v15  }
  0x14   :  { %104 = vperm.xlu1 %1670, %v53_v15   ;;  %1526 = vmatpush3.bf16.msra.mxu0 %v1523_v18 }
  0x15   :  { %1534 = vmatpush3.bf16.msra.mxu1 %v1531_v53 }
  0x16   :  { %1536 = vmatprep.subr.bf16.mxu1 %v1535_v56 }
  0x17   :  { %203 = vperm.xlu0 %1667, %v54_v19  }
  0x18   :  { %109 = vperm.xlu1 %1670, %v54_v19  }
  0x19   :  { %1538 = vmatpush3.bf16.msra.mxu1 %v1535_v56 }
  0x1a   :  { %1540 = vmatprep.subr.bf16.mxu1 %v1539_v59 }
  0x1b   :  { %207 = vperm.xlu0 %1667, %v55_v20  }
  0x1c   :  { %114 = vperm.xlu1 %1670, %v55_v20  }
  0x1d   :  { %1542 = vmatpush3.bf16.msra.mxu1 %v1539_v59 }
  0x1e   :  { %1544 = vmatprep.subr.bf16.mxu1 %v1543_v62 }
  0x1f   :  { %211 = vperm.xlu0 %1667, %v56_v21  }
  0x20   :  { %119 = vperm.xlu1 %1670, %v56_v21   ;;  %v1929_v21 = vld [vmem:[%s2403_s3] ss:$0 sm:$0xff] }
  0x21   :  { %1546 = vmatpush3.bf16.msra.mxu1 %v1543_v62 }
  0x22   :  { %1548 = vmatprep.subr.bf16.mxu1 %v1547_v2 }
  0x23   :  { %215 = vperm.xlu0 %1667, %v57_v22  }
  0x24   :  { %124 = vperm.xlu1 %1670, %v57_v22  }
  0x25   :  { %1550 = vmatpush3.bf16.msra.mxu1 %v1547_v2 }
  0x26   :  { %1552 = vmatprep.subr.bf16.mxu1 %v1551_v6 }
  0x27   :  { %219 = vperm.xlu0 %1667, %v58_v23  }
  0x28   :  { %129 = vperm.xlu1 %1670, %v58_v23  }
  0x29   :  { %1554 = vmatpush3.bf16.msra.mxu1 %v1551_v6 }
  0x2b   :  { %223 = vperm.xlu0 %1667, %v59_v24  }
  0x2c   :  { %134 = vperm.xlu1 %1670, %v59_v24  }
  0x2f   :  { %227 = vperm.xlu0 %1667, %v60_v25  }
  0x30   :  { %139 = vperm.xlu1 %1670, %v60_v25  }
  0x33   :  { %231 = vperm.xlu0 %1667, %v61_v26  }
  0x34   :  { %144 = vperm.xlu1 %1670, %v61_v26  }
  0x37   :  { %235 = vperm.xlu0 %1667, %v62_v27  }
  0x38   :  { %149 = vperm.xlu1 %1670, %v62_v27  }
  0x3b   :  { %239 = vperm.xlu0 %1667, %v63_v28  }
  0x3c   :  { %154 = vperm.xlu1 %1670, %v63_v28  }
  0x3f   :  { %243 = vperm.xlu0 %1667, %v64_v30  }
  0x40   :  { %159 = vperm.xlu1 %1670, %v64_v30  }
  0x43   :  { %1671 = vset.pattern.permute.xlu0 %v1672_v0 }
  0x44   :  { %763 = vperm.xlu1 %1670, %v746_v32  }
  0x48   :  { %769 = vperm.xlu1 %1670, %v748_v34  }
  0x4c   :  { %772 = vperm.xlu1 %1670, %v749_v36  }
  0x50   :  { %778 = vperm.xlu1 %1670, %v751_v38  }
  0x54   :  { %784 = vperm.xlu1 %1670, %v753_v40  }
  0x58   :  { %790 = vperm.xlu1 %1670, %v755_v42  }
  0x5c   :  { %796 = vperm.xlu1 %1670, %v757_v44  }
  0x60   :  { %802 = vperm.xlu1 %1670, %v759_v46  }
  0x64   :  { %808 = vperm.xlu1 %1670, %v761_v47  }
  0x81   :  { %v90_v11 = vpop.permute.xlu1 %89  ;;  %v85_v12 = vpop.permute.xlu0 %84 }
  0x82   :  { %v167_v17 = vmul.f32 %v1917_v13, %v90_v11  ;;  %v166_v18 = vmul.f32 %v1917_v13, %v85_v12 }
  0x86   :  { %v188_v15 = vpop.permute.xlu1 %187  ;;  %v184_v16 = vpop.permute.xlu0 %183 }
  0x87   :  { %v251_v19 = vmul.f32 %v1920_v14, %v188_v15  ;;  %v250_v20 = vmul.f32 %v1920_v14, %v184_v16 }
  0x89   :  { %v267_v22 = vadd.f32 %v251_v19, %v167_v17  ;;  %v266_v23 = vadd.f32 %v250_v20, %v166_v18 }
  0x8a   :  { %v192_v24 = vpop.permute.xlu0 %191 }
  0x8b   :  { %v290_v25 = vadd.f32 %v1929_v21, %v267_v22  ;;  %v252_v26 = vmul.f32 %v1920_v14, %v192_v24  ;;  %v95_v27 = vpop.permute.xlu1 %94  ;;  %v289_v28 = vadd.f32 %v1929_v21, %v266_v23 }
  0x8c   :  { %v168_v29 = vmul.f32 %v1917_v13, %v95_v27 }
  0x8d   :  { %v306_v30 = vmax.f32 %v290_v25, 0.0  ;;  %v305_v31 = vmax.f32 %v289_v28, 0.0 }
  0x8e   :  { %v268_v32 = vadd.f32 %v252_v26, %v168_v29  ;;  %v196_v33 = vpop.permute.xlu0 %195 }
  0x8f   :  { %v253_v34 = vmul.f32 %v1920_v14, %v196_v33  ;;  %v100_v35 = vpop.permute.xlu1 %99  ;;  %1431 = vmatprep.mubr.msk.f32.mxu0 %vm336_vm9, %v305_v31 }
  0x90   :  { %v291_v36 = vadd.f32 %v1929_v21, %v268_v32  ;;  %v169_v37 = vmul.f32 %v1917_v13, %v100_v35  ;;  %1432 = vmatmul.mubr.msk.f32.vlgmr.msra.gmra.mrb[0].mxu0 %vm336_vm9, %v306_v30 }
  0x92   :  { %v307_v38 = vmax.f32 %v291_v36, 0.0  ;;  %v269_v39 = vadd.f32 %v253_v34, %v169_v37  ;;  %v200_v40 = vpop.permute.xlu0 %199 }
  0x93   :  { %v254_v41 = vmul.f32 %v1920_v14, %v200_v40  ;;  %v105_v42 = vpop.permute.xlu1 %104 }
  0x94   :  { %v292_v43 = vadd.f32 %v1929_v21, %v269_v39  ;;  %v170_v44 = vmul.f32 %v1917_v13, %v105_v42  ;;  %1434 = vmatprep.mubr.msk.f32.mxu0 %vm336_vm9, %v307_v38 }
  0x96   :  { %v308_v45 = vmax.f32 %v292_v43, 0.0  ;;  %v270_v46 = vadd.f32 %v254_v41, %v170_v44  ;;  %v204_v47 = vpop.permute.xlu0 %203 }
  0x97   :  { %v255_v48 = vmul.f32 %v1920_v14, %v204_v47  ;;  %v110_v49 = vpop.permute.xlu1 %109 }
  0x98   :  { %v293_v50 = vadd.f32 %v1929_v21, %v270_v46  ;;  %v171_v51 = vmul.f32 %v1917_v13, %v110_v49  ;;  %1435 = vmatmul.mubr.msk.f32.gmra.mrb[2].mxu0 %vm336_vm9, %v308_v45 }
  0x9a   :  { %v309_v52 = vmax.f32 %v293_v50, 0.0  ;;  %v271_v53 = vadd.f32 %v255_v48, %v171_v51  ;;  %v208_v54 = vpop.permute.xlu0 %207 }
  0x9b   :  { %v256_v55 = vmul.f32 %v1920_v14, %v208_v54  ;;  %v115_v56 = vpop.permute.xlu1 %114 }
  0x9c   :  { %v294_v57 = vadd.f32 %v1929_v21, %v271_v53  ;;  %v172_v58 = vmul.f32 %v1917_v13, %v115_v56  ;;  %1437 = vmatprep.mubr.msk.f32.mxu0 %vm336_vm9, %v309_v52 }
  0x9e   :  { %v310_v59 = vmax.f32 %v294_v57, 0.0  ;;  %v272_v60 = vadd.f32 %v256_v55, %v172_v58  ;;  %v212_v61 = vpop.permute.xlu0 %211 }
  0x9f   :  { %v257_v62 = vmul.f32 %v1920_v14, %v212_v61  ;;  %v120_v63 = vpop.permute.xlu1 %119 }
  0xa0   :  { %v295_v1 = vadd.f32 %v1929_v21, %v272_v60  ;;  %v173_v2 = vmul.f32 %v1917_v13, %v120_v63  ;;  %1438 = vmatmul.mubr.msk.f32.gmra.mrb[4].mxu0 %vm336_vm9, %v310_v59 }
  0xa2   :  { %v311_v3 = vmax.f32 %v295_v1, 0.0  ;;  %v273_v4 = vadd.f32 %v257_v62, %v173_v2  ;;  %v216_v5 = vpop.permute.xlu0 %215 }
  0xa3   :  { %v258_v6 = vmul.f32 %v1920_v14, %v216_v5  ;;  %v125_v7 = vpop.permute.xlu1 %124  ;;  %v561_v5 = vld [vmem:[%s2401_s6 + $0x78] sm:$0xff] }
  0xa4   :  { %v296_v10 = vadd.f32 %v1929_v21, %v273_v4  ;;  %v174_v11 = vmul.f32 %v1917_v13, %v125_v7  ;;  %1440 = vmatprep.mubr.msk.f32.mxu0 %vm336_vm9, %v311_v3 }
  0xa6   :  { %v312_v12 = vmax.f32 %v296_v10, 0.0  ;;  %v274_v15 = vadd.f32 %v258_v6, %v174_v11  ;;  %v220_v16 = vpop.permute.xlu0 %219  ;;  %v69_v6 = vld [vmem:[%s2400_s1 + $0x20] sm:$0xff]  ;;  %v71_v10 = vld [vmem:[%s2400_s1 + $0x30] sm:$0xff] }
  0xa7   :  { %v259_v17 = vmul.f32 %v1920_v14, %v220_v16  ;;  %v130_v18 = vpop.permute.xlu1 %129  ;;  %vm734_vm11 = vcmp.gt.f32.partialorder %v69_v6, 0.5  ;;  %vm736_vm12 = vcmp.gt.f32.partialorder %v71_v10, 0.5  ;;  %v75_v16 = vld [vmem:[%s2400_s1 + $0x50] sm:$0xff]  ;;  %v940_v6 = vld [vmem:[%s2405_s8 + $0x8] sm:$0xff]  ;;  %v939_v10 = vld [vmem:[%s2405_s8] sm:$0xff] }
  0xa8   :  { %v297_v19 = vadd.f32 %v1929_v21, %v274_v15  ;;  %v175_v20 = vmul.f32 %v1917_v13, %v130_v18  ;;  %1441 = vmatmul.mubr.msk.f32.gmra.mrb[6].mxu0 %vm336_vm9, %v312_v12  ;;  %v750_v11 = vsel %vm734_vm11, 1, %v1672_v0  ;;  %v73_v12 = vld [vmem:[%s2400_s1 + $0x40] sm:$0xff]  ;;  %v752_v15 = vsel %vm736_vm12, 1, %v1672_v0 }
  0xa9   :  { %vm738_vm13 = vcmp.gt.f32.partialorder %v73_v12, 0.5  ;;  %vm740_vm14 = vcmp.gt.f32.partialorder %v75_v16, 0.5  ;;  %v77_v18 = vld [vmem:[%s2400_s1 + $0x60] sm:$0xff]  ;;  %v941_v12 = vld [vmem:[%s2405_s8 + $0x10] sm:$0xff]  ;;  %v944_v16 = vld [vmem:[%s2405_s8 + $0x28] sm:$0xff]  ;;  %vm925_vm11 = vcmask 1042434  }
  0xaa   :  { %v313_v22 = vmax.f32 %v297_v19, 0.0  ;;  %v275_v23 = vadd.f32 %v259_v17, %v175_v20  ;;  %v224_v24 = vpop.permute.xlu0 %223  ;;  %v754_v17 = vsel %vm738_vm13, 1, %v1672_v0  ;;  %v756_v19 = vsel %vm740_vm14, 1, %v1672_v0  ;;  %v79_v20 = vld [vmem:[%s2400_s1 + $0x70] sm:$0xff] }
  0xab   :  { %v260_v25 = vmul.f32 %v1920_v14, %v224_v24  ;;  %v135_v26 = vpop.permute.xlu1 %134  ;;  %vm742_vm15 = vcmp.gt.f32.partialorder %v77_v18, 0.5  ;;  %vm744_vm0 = vcmp.gt.f32.partialorder %v79_v20, 0.5  ;;  %v1304_v24 = vld [vmem:[%s2404_s5] ss:$0 sm:$0xff]  ;;  %v945_v20 = vld [vmem:[%s2405_s8 + $0x30] sm:$0xff]  ;;  %vm927_vm14 = vcmask 1043459  }
  0xac   :  { %v298_v27 = vadd.f32 %v1929_v21, %v275_v23  ;;  %v176_v28 = vmul.f32 %v1917_v13, %v135_v26  ;;  %1443 = vmatprep.mubr.msk.f32.mxu0 %vm336_vm9, %v313_v22  ;;  %v758_v22 = vsel %vm742_vm15, 1, %v1672_v0  ;;  %v760_v23 = vsel %vm744_vm0, 1, %v1672_v0 }
  0xae   :  { %v314_v29 = vmax.f32 %v298_v27, 0.0  ;;  %v276_v30 = vadd.f32 %v260_v25, %v176_v28  ;;  %v228_v31 = vpop.permute.xlu0 %227 }
  0xaf   :  { %v261_v32 = vmul.f32 %v1920_v14, %v228_v31  ;;  %v140_v33 = vpop.permute.xlu1 %139 }
  0xb0   :  { %v299_v34 = vadd.f32 %v1929_v21, %v276_v30  ;;  %v177_v35 = vmul.f32 %v1917_v13, %v140_v33  ;;  %1444 = vmatmul.mubr.msk.f32.gmra.mrb[8].mxu0 %vm336_vm9, %v314_v29 }
  0xb2   :  { %v315_v36 = vmax.f32 %v299_v34, 0.0  ;;  %v277_v37 = vadd.f32 %v261_v32, %v177_v35  ;;  %v232_v38 = vpop.permute.xlu0 %231 }
  0xb3   :  { %v262_v39 = vmul.f32 %v1920_v14, %v232_v38  ;;  %v145_v40 = vpop.permute.xlu1 %144 }
  0xb4   :  { %v300_v41 = vadd.f32 %v1929_v21, %v277_v37  ;;  %v178_v42 = vmul.f32 %v1917_v13, %v145_v40  ;;  %1446 = vmatprep.mubr.msk.f32.mxu0 %vm336_vm9, %v315_v36 }
  0xb6   :  { %v316_v43 = vmax.f32 %v300_v41, 0.0  ;;  %v278_v44 = vadd.f32 %v262_v39, %v178_v42  ;;  %v236_v45 = vpop.permute.xlu0 %235 }
  0xb7   :  { %v263_v46 = vmul.f32 %v1920_v14, %v236_v45  ;;  %v150_v47 = vpop.permute.xlu1 %149 }
  0xb8   :  { %v301_v48 = vadd.f32 %v1929_v21, %v278_v44  ;;  %v179_v49 = vmul.f32 %v1917_v13, %v150_v47  ;;  %1447 = vmatmul.mubr.msk.f32.gmra.mrb[10].mxu0 %vm336_vm9, %v316_v43 }
  0xba   :  { %v317_v50 = vmax.f32 %v301_v48, 0.0  ;;  %v279_v51 = vadd.f32 %v263_v46, %v179_v49  ;;  %v240_v52 = vpop.permute.xlu0 %239 }
  0xbb   :  { %v264_v53 = vmul.f32 %v1920_v14, %v240_v52  ;;  %v155_v54 = vpop.permute.xlu1 %154 }
  0xbc   :  { %v302_v55 = vadd.f32 %v1929_v21, %v279_v51  ;;  %v180_v56 = vmul.f32 %v1917_v13, %v155_v54  ;;  %1449 = vmatprep.mubr.msk.f32.mxu0 %vm336_vm9, %v317_v50 }
  0xbe   :  { %v318_v57 = vmax.f32 %v302_v55, 0.0  ;;  %v280_v58 = vadd.f32 %v264_v53, %v180_v56  ;;  %v244_v59 = vpop.permute.xlu0 %243 }
  0xbf   :  { %v265_v60 = vmul.f32 %v1920_v14, %v244_v59  ;;  %v160_v61 = vpop.permute.xlu1 %159  ;;  %v560_v14 = vld [vmem:[%s2401_s6 + $0x70] sm:$0xff] }
  0xc0   :  { %v303_v62 = vadd.f32 %v1929_v21, %v280_v58  ;;  %v181_v63 = vmul.f32 %v1917_v13, %v160_v61  ;;  %1450 = vmatmul.mubr.msk.f32.gmra.mrb[12].mxu0 %vm336_vm9, %v318_v57  ;;  %v1555_v13 = vpack.c.bf16 %v561_v5, %v560_v14 }
  0xc2   :  { %v319_v1 = vmax.f32 %v303_v62, 0.0  ;;  %v281_v2 = vadd.f32 %v265_v60, %v181_v63  ;;  %1556 = vmatprep.subr.bf16.mxu1 %v1555_v13 }
  0xc3   :  { %1558 = vmatpush3.bf16.msra.mxu1 %v1555_v13 }
  0xc4   :  { %v304_v3 = vadd.f32 %v1929_v21, %v281_v2  ;;  %1452 = vmatprep.mubr.msk.f32.mxu0 %vm336_vm9, %v319_v1  ;;  %v66_v21 = vld [vmem:[%s2400_s1 + $0x8] sm:$0xff] }
  0xc5   :  { %vm731_vm10 = vcmp.gt.f32.partialorder %v66_v21, 0.5 }
  0xc6   :  { %v320_v4 = vmax.f32 %v304_v3, 0.0  ;;  %v747_v7 = vsel %vm731_vm10, 1, %v1672_v0 }
  0xc7   :  { %766 = vperm.xlu0 %1671, %v747_v7   ;;  %v942_v7 = vld [vmem:[%s2405_s8 + $0x18] sm:$0xff] }
  0xc8   :  { %1453 = vmatmul.mubr.msk.f32.gmra.mrb[14].mxu0 %vm336_vm9, %v320_v4  ;;  %vm923_vm9 = vcmask 1041409  }
  0xcb   :  { %775 = vperm.xlu0 %1671, %v750_v11   ;;  %v1559_v11 = vpack.c.bf16 %v942_v7, %v940_v6 }
  0xcd   :  { %1560 = vmatprep.subr.bf16.mxu0 %v1559_v11  ;;  %v1068_v11 = vld [vmem:[%s2406_s10 + $0x110] sm:$0xff] }
  0xcf   :  { %781 = vperm.xlu0 %1671, %v752_v15   ;;  %v1561_v15 = vpack.c.bf16 %v941_v12, %v939_v10  ;;  %v1066_v10 = vld [vmem:[%s2406_s10 + $0x100] sm:$0xff]  ;;  %v1071_v12 = vld [vmem:[%s2406_s10 + $0x128] sm:$0xff] }
  0xd1   :  { %1562 = vmatpush1.bf16.msra.mxu0 %v1561_v15  ;;  %v1073_v15 = vld [vmem:[%s2406_s10 + $0x138] sm:$0xff] }
  0xd3   :  { %787 = vperm.xlu0 %1671, %v754_v17   ;;  %v946_v17 = vld [vmem:[%s2405_s8 + $0x38] sm:$0xff] }
  0xd4   :  { %v1563_v18 = vpack.c.bf16 %v946_v17, %v944_v16  ;;  %v1601_v16 = vpack.c.bf16 %v1068_v11, %v1066_v10  ;;  %v1603_v17 = vpack.c.bf16 %v1073_v15, %v1071_v12 }
  0xd6   :  { %1564 = vmatprep.subr.bf16.mxu0 %v1563_v18  ;;  %v1070_v18 = vld [vmem:[%s2406_s10 + $0x120] sm:$0xff] }
  0xd7   :  { %793 = vperm.xlu0 %1671, %v756_v19   ;;  %v943_v19 = vld [vmem:[%s2405_s8 + $0x20] sm:$0xff] }
  0xdb   :  { %799 = vperm.xlu0 %1671, %v758_v22   ;;  %v1565_v22 = vpack.c.bf16 %v945_v20, %v943_v19  ;;  %v1072_v19 = vld [vmem:[%s2406_s10 + $0x130] sm:$0xff]  ;;  %v1075_v20 = vld [vmem:[%s2406_s10 + $0x148] sm:$0xff] }
  0xdd   :  { %1566 = vmatpush1.bf16.msra.mxu0 %v1565_v22  ;;  %v1077_v22 = vld [vmem:[%s2406_s10 + $0x158] sm:$0xff] }
  0xdf   :  { %805 = vperm.xlu0 %1671, %v760_v23   ;;  %v1674_v23 = vmov 0.0  }
  0xe0   :  { %1025 = vmatprep.mubr.f32.mxu0 %v1674_v23  ;;  %v1605_v23 = vpack.c.bf16 %v1072_v19, %v1070_v18 }
 0x163   :  { %v1433_v25 = vpop.f32.mrb[0].mxu0 }
 0x164   :  { %v457_v26 = vadd.f32 %v1433_v25, %v1304_v24  ;;  %v451_v27 = vpop.f32.mrb[1].mxu0  ;;  %v1037_v25 = vld [vmem:[%s2406_s10 + $0x18] sm:$0xff] }
 0x165   :  { %v452_v28 = vadd.f32 %v1304_v24, %v451_v27 }
 0x166   :  { %v531_v30 = vmax.f32 %v457_v26, 0.0  ;;  %v1034_v26 = vld [vmem:[%s2406_s10] sm:$0xff] }
 0x167   :  { %v530_v29 = vmax.f32 %v452_v28, 0.0  ;;  %v1036_v28 = vld [vmem:[%s2406_s10 + $0x10] sm:$0xff] }
 0x169   :  { %1487 = vmatprep.mubr.f32.mxu1 %v530_v29  ;;  %v1039_v29 = vld [vmem:[%s2406_s10 + $0x28] sm:$0xff] }
 0x16a   :  { %1488 = vmatmul.mubr.f32.vlgmr.msra.gmra.mrb[0].mxu1 %v531_v30  ;;  %v1041_v30 = vld [vmem:[%s2406_s10 + $0x38] sm:$0xff] }
 0x16b   :  { %v1436_v31 = vpop.f32.mrb[2].mxu0 }
 0x16c   :  { %v467_v32 = vadd.f32 %v1436_v31, %v1304_v24  ;;  %v461_v33 = vpop.f32.mrb[3].mxu0  ;;  %v1569_v31 = vpack.c.bf16 %v1036_v28, %v1034_v26  ;;  %v1076_v26 = vld [vmem:[%s2406_s10 + $0x150] sm:$0xff]  ;;  %v1081_v28 = vld [vmem:[%s2406_s10 + $0x178] sm:$0xff] }
 0x16d   :  { %v462_v34 = vadd.f32 %v1304_v24, %v461_v33  ;;  %v1038_v33 = vld [vmem:[%s2406_s10 + $0x20] sm:$0xff] }
 0x16e   :  { %v533_v36 = vmax.f32 %v467_v32, 0.0  ;;  %v1571_v32 = vpack.c.bf16 %v1041_v30, %v1039_v29 }
 0x16f   :  { %v532_v35 = vmax.f32 %v462_v34, 0.0  ;;  %v1040_v34 = vld [vmem:[%s2406_s10 + $0x30] sm:$0xff] }
 0x171   :  { %1490 = vmatprep.mubr.f32.mxu1 %v532_v35  ;;  %v1043_v35 = vld [vmem:[%s2406_s10 + $0x48] sm:$0xff] }
 0x172   :  { %1491 = vmatmul.mubr.f32.gmra.mrb[2].mxu1 %v533_v36  ;;  %v1045_v36 = vld [vmem:[%s2406_s10 + $0x58] sm:$0xff] }
 0x173   :  { %v1439_v0 = vpop.f32.mrb[4].mxu0 }
 0x174   :  { %v477_v37 = vadd.f32 %v1439_v0, %v1304_v24  ;;  %v471_v38 = vpop.f32.mrb[5].mxu0  ;;  %v1573_v0 = vpack.c.bf16 %v1040_v34, %v1038_v33  ;;  %v1083_v33 = vld [vmem:[%s2406_s10 + $0x188] sm:$0xff]  ;;  %v1085_v34 = vld [vmem:[%s2406_s10 + $0x198] sm:$0xff] }
 0x175   :  { %v472_v39 = vadd.f32 %v1304_v24, %v471_v38  ;;  %v1042_v38 = vld [vmem:[%s2406_s10 + $0x40] sm:$0xff] }
 0x176   :  { %v535_v41 = vmax.f32 %v477_v37, 0.0  ;;  %v1575_v37 = vpack.c.bf16 %v1045_v36, %v1043_v35  ;;  %v764_v36 = vpop.permute.xlu1 %763 }
 0x177   :  { %v534_v40 = vmax.f32 %v472_v39, 0.0  ;;  %v1044_v39 = vld [vmem:[%s2406_s10 + $0x50] sm:$0xff]  ;;  %vm810_vm3 = vcmp.eq.s32.totalorder %v764_v36, 1 }
 0x179   :  { %1493 = vmatprep.mubr.f32.mxu1 %v534_v40  ;;  %v1047_v40 = vld [vmem:[%s2406_s10 + $0x68] sm:$0xff] }
 0x17a   :  { %1494 = vmatmul.mubr.f32.gmra.mrb[4].mxu1 %v535_v41  ;;  %v1049_v41 = vld [vmem:[%s2406_s10 + $0x78] sm:$0xff] }
 0x17b   :  { %v1442_v42 = vpop.f32.mrb[6].mxu0 }
 0x17c   :  { %v487_v43 = vadd.f32 %v1442_v42, %v1304_v24  ;;  %v481_v44 = vpop.f32.mrb[7].mxu0  ;;  %v1577_v42 = vpack.c.bf16 %v1044_v39, %v1042_v38  ;;  %v1084_v38 = vld [vmem:[%s2406_s10 + $0x190] sm:$0xff]  ;;  %v2211_v39 = vld [vmem:[%s2407_s7] ss:$0 sm:$0xff] }
 0x17d   :  { %v482_v45 = vadd.f32 %v1304_v24, %v481_v44  ;;  %v1046_v44 = vld [vmem:[%s2406_s10 + $0x60] sm:$0xff] }
 0x17e   :  { %v537_v47 = vmax.f32 %v487_v43, 0.0  ;;  %v1579_v43 = vpack.c.bf16 %v1049_v41, %v1047_v40  ;;  %v1087_v40 = vld [vmem:[%s2406_s10 + $0x1a8] sm:$0xff]  ;;  %v1089_v41 = vld [vmem:[%s2406_s10 + $0x1b8] sm:$0xff] }
 0x17f   :  { %v536_v46 = vmax.f32 %v482_v45, 0.0  ;;  %v1048_v45 = vld [vmem:[%s2406_s10 + $0x70] sm:$0xff] }
 0x181   :  { %1496 = vmatprep.mubr.f32.mxu1 %v536_v46  ;;  %v1051_v46 = vld [vmem:[%s2406_s10 + $0x88] sm:$0xff] }
 0x182   :  { %1497 = vmatmul.mubr.f32.gmra.mrb[6].mxu1 %v537_v47  ;;  %v1053_v47 = vld [vmem:[%s2406_s10 + $0x98] sm:$0xff] }
 0x183   :  { %v1445_v48 = vpop.f32.mrb[8].mxu0 }
 0x184   :  { %v497_v49 = vadd.f32 %v1445_v48, %v1304_v24  ;;  %v491_v50 = vpop.f32.mrb[9].mxu0  ;;  %v1581_v48 = vpack.c.bf16 %v1048_v45, %v1046_v44 }
 0x185   :  { %v492_v51 = vadd.f32 %v1304_v24, %v491_v50  ;;  %v1050_v50 = vld [vmem:[%s2406_s10 + $0x80] sm:$0xff] }
 0x186   :  { %v539_v53 = vmax.f32 %v497_v49, 0.0  ;;  %v1583_v49 = vpack.c.bf16 %v1053_v47, %v1051_v46  ;;  %v1619_v47 = vpack.c.bf16 %v1089_v41, %v1087_v40 }
 0x187   :  { %v538_v52 = vmax.f32 %v492_v51, 0.0  ;;  %v1052_v51 = vld [vmem:[%s2406_s10 + $0x90] sm:$0xff] }
 0x189   :  { %1499 = vmatprep.mubr.f32.mxu1 %v538_v52  ;;  %v1055_v52 = vld [vmem:[%s2406_s10 + $0xa8] sm:$0xff] }
 0x18a   :  { %1500 = vmatmul.mubr.f32.gmra.mrb[8].mxu1 %v539_v53  ;;  %v1057_v53 = vld [vmem:[%s2406_s10 + $0xb8] sm:$0xff] }
 0x18b   :  { %v1448_v54 = vpop.f32.mrb[10].mxu0 }
 0x18c   :  { %v507_v55 = vadd.f32 %v1448_v54, %v1304_v24  ;;  %v501_v56 = vpop.f32.mrb[11].mxu0  ;;  %v1585_v54 = vpack.c.bf16 %v1052_v51, %v1050_v50  ;;  %v1091_v51 = vld [vmem:[%s2406_s10 + $0x1c8] sm:$0xff] }
 0x18d   :  { %v502_v57 = vadd.f32 %v1304_v24, %v501_v56  ;;  %v1054_v56 = vld [vmem:[%s2406_s10 + $0xa0] sm:$0xff] }
 0x18e   :  { %v541_v59 = vmax.f32 %v507_v55, 0.0  ;;  %v1587_v55 = vpack.c.bf16 %v1057_v53, %v1055_v52  ;;  %v1093_v52 = vld [vmem:[%s2406_s10 + $0x1d8] sm:$0xff]  ;;  %v770_v53 = vpop.permute.xlu1 %769 }
 0x18f   :  { %v540_v58 = vmax.f32 %v502_v57, 0.0  ;;  %v1056_v57 = vld [vmem:[%s2406_s10 + $0xb0] sm:$0xff]  ;;  %vm812_vm5 = vcmp.eq.s32.totalorder %v770_v53, 1 }
 0x191   :  { %1502 = vmatprep.mubr.f32.mxu1 %v540_v58  ;;  %v1059_v58 = vld [vmem:[%s2406_s10 + $0xc8] sm:$0xff] }
 0x192   :  { %1503 = vmatmul.mubr.f32.gmra.mrb[10].mxu1 %v541_v59  ;;  %v1061_v59 = vld [vmem:[%s2406_s10 + $0xd8] sm:$0xff] }
 0x193   :  { %v1451_v60 = vpop.f32.mrb[12].mxu0 }
 0x194   :  { %v517_v61 = vadd.f32 %v1451_v60, %v1304_v24  ;;  %v511_v62 = vpop.f32.mrb[13].mxu0  ;;  %v1589_v60 = vpack.c.bf16 %v1056_v57, %v1054_v56 }
 0x195   :  { %v512_v63 = vadd.f32 %v1304_v24, %v511_v62  ;;  %v1058_v62 = vld [vmem:[%s2406_s10 + $0xc0] sm:$0xff] }
 0x196   :  { %v543_v2 = vmax.f32 %v517_v61, 0.0  ;;  %v1591_v61 = vpack.c.bf16 %v1061_v59, %v1059_v58  ;;  %v1623_v58 = vpack.c.bf16 %v1093_v52, %v1091_v51 }
 0x197   :  { %v542_v1 = vmax.f32 %v512_v63, 0.0  ;;  %v1060_v63 = vld [vmem:[%s2406_s10 + $0xd0] sm:$0xff] }
 0x199   :  { %1505 = vmatprep.mubr.f32.mxu1 %v542_v1  ;;  %v1063_v1 = vld [vmem:[%s2406_s10 + $0xe8] sm:$0xff] }
 0x19a   :  { %1506 = vmatmul.mubr.f32.gmra.mrb[12].mxu1 %v543_v2  ;;  %v1065_v2 = vld [vmem:[%s2406_s10 + $0xf8] sm:$0xff] }
 0x19b   :  { %v1454_v3 = vpop.f32.mrb[14].mxu0 }
 0x19c   :  { %v527_v4 = vadd.f32 %v1454_v3, %v1304_v24  ;;  %v521_v14 = vpop.f32.mrb[15].mxu0  ;;  %v1593_v3 = vpack.c.bf16 %v1060_v63, %v1058_v62 }
 0x19d   :  { %v522_v5 = vadd.f32 %v1304_v24, %v521_v14  ;;  %v1035_v24 = vld [vmem:[%s2406_s10 + $0x8] sm:$0xff]  ;;  %v1062_v14 = vld [vmem:[%s2406_s10 + $0xe0] sm:$0xff] }
 0x19e   :  { %v545_v21 = vmax.f32 %v527_v4, 0.0  ;;  %v1567_v27 = vpack.c.bf16 %v1037_v25, %v1035_v24  ;;  %v1595_v4 = vpack.c.bf16 %v1065_v2, %v1063_v1  ;;  %v1607_v24 = vpack.c.bf16 %v1077_v22, %v1075_v20  ;;  %v1074_v25 = vld [vmem:[%s2406_s10 + $0x140] sm:$0xff]  ;;  %v773_v1 = vpop.permute.xlu1 %772 }
 0x19f   :  { %v544_v13 = vmax.f32 %v522_v5, 0.0  ;;  %v1064_v5 = vld [vmem:[%s2406_s10 + $0xf0] sm:$0xff]  ;;  %v1609_v29 = vpack.c.bf16 %v1076_v26, %v1074_v25  ;;  %vm813_vm4 = vcmp.eq.s32.totalorder %v773_v1, 1 }
 0x1a0   :  { %1568 = vmatprep.subr.bf16.mxu1 %v1567_v27  ;;  %v1597_v6 = vpack.c.bf16 %v1064_v5, %v1062_v14  ;;  %v1079_v27 = vld [vmem:[%s2406_s10 + $0x168] sm:$0xff] }
 0x1a1   :  { %1508 = vmatprep.mubr.f32.mxu1 %v544_v13  ;;  %1570 = vmatpush1.bf16.msra.mxu1 %v1569_v31  ;;  %v1067_v13 = vld [vmem:[%s2406_s10 + $0x108] sm:$0xff]  ;;  %v1611_v30 = vpack.c.bf16 %v1081_v28, %v1079_v27  ;;  %v1078_v31 = vld [vmem:[%s2406_s10 + $0x160] sm:$0xff] }
 0x1a2   :  { %1509 = vmatmul.mubr.f32.gmra.mrb[14].mxu1 %v545_v21  ;;  %1572 = vmatprep.subr.bf16.mxu1 %v1571_v32  ;;  %v1069_v21 = vld [vmem:[%s2406_s10 + $0x118] sm:$0xff]  ;;  %v1080_v32 = vld [vmem:[%s2406_s10 + $0x170] sm:$0xff] }
 0x1a3   :  { %v1599_v7 = vpack.c.bf16 %v1069_v21, %v1067_v13  ;;  %v1613_v35 = vpack.c.bf16 %v1080_v32, %v1078_v31 }
 0x1a5   :  { %1574 = vmatpush1.bf16.msra.mxu1 %v1573_v0  ;;  %v1615_v0 = vpack.c.bf16 %v1085_v34, %v1083_v33 }
 0x1a6   :  { %1576 = vmatprep.subr.bf16.mxu1 %v1575_v37  ;;  %v1082_v37 = vld [vmem:[%s2406_s10 + $0x180] sm:$0xff] }
 0x1a7   :  { %v1617_v44 = vpack.c.bf16 %v1084_v38, %v1082_v37 }
 0x1a9   :  { %1578 = vmatpush1.bf16.msra.mxu1 %v1577_v42  ;;  %v767_v42 = vpop.permute.xlu0 %766 }
 0x1aa   :  { %1580 = vmatprep.subr.bf16.mxu1 %v1579_v43  ;;  %vm811_vm1 = vcmp.eq.s32.totalorder %v767_v42, 1 }
 0x1ad   :  { %1582 = vmatpush1.bf16.msra.mxu1 %v1581_v48  ;;  %v1086_v48 = vld [vmem:[%s2406_s10 + $0x1a0] sm:$0xff]  ;;  %v776_v22 = vpop.permute.xlu0 %775 }
 0x1ae   :  { %1584 = vmatprep.subr.bf16.mxu1 %v1583_v49  ;;  %v1088_v49 = vld [vmem:[%s2406_s10 + $0x1b0] sm:$0xff]  ;;  %vm814_vm6 = vcmp.eq.s32.totalorder %v776_v22, 1 }
 0x1af   :  { %v1621_v56 = vpack.c.bf16 %v1088_v49, %v1086_v48 }
 0x1b1   :  { %1586 = vmatpush1.bf16.msra.mxu1 %v1585_v54  ;;  %v782_v42 = vpop.permute.xlu0 %781 }
 0x1b2   :  { %1588 = vmatprep.subr.bf16.mxu1 %v1587_v55  ;;  %vm816_vm10 = vcmp.eq.s32.totalorder %v782_v42, 1 }
 0x1b5   :  { %1590 = vmatpush1.bf16.msra.mxu1 %v1589_v60 }
 0x1b6   :  { %1592 = vmatprep.subr.bf16.mxu1 %v1591_v61 }
 0x1b9   :  { %1594 = vmatpush1.bf16.msra.mxu1 %v1593_v3 }
 0x1ba   :  { %1596 = vmatprep.subr.bf16.mxu1 %v1595_v4 }
 0x1bd   :  { %1598 = vmatpush1.bf16.msra.mxu1 %v1597_v6 }
 0x1be   :  { %1600 = vmatprep.subr.bf16.mxu1 %v1599_v7 }
 0x1c1   :  { %1602 = vmatpush1.bf16.msra.mxu1 %v1601_v16 }
 0x1c2   :  { %1604 = vmatprep.subr.bf16.mxu1 %v1603_v17  ;;  %v779_v17 = vpop.permute.xlu1 %778 }
 0x1c3   :  { %vm815_vm7 = vcmp.eq.s32.totalorder %v779_v17, 1 }
 0x1c5   :  { %1606 = vmatpush1.bf16.msra.mxu1 %v1605_v23 }
 0x1c6   :  { %1608 = vmatprep.subr.bf16.mxu1 %v1607_v24  ;;  %v785_v33 = vpop.permute.xlu1 %784 }
 0x1c7   :  { %vm817_vm8 = vcmp.eq.s32.totalorder %v785_v33, 1 }
 0x1c9   :  { %1610 = vmatpush1.bf16.msra.mxu1 %v1609_v29 }
 0x1ca   :  { %1612 = vmatprep.subr.bf16.mxu1 %v1611_v30 }
 0x1cd   :  { %1614 = vmatpush1.bf16.msra.mxu1 %v1613_v35 }
 0x1ce   :  { %1616 = vmatprep.subr.bf16.mxu1 %v1615_v0 }
 0x1d1   :  { %1618 = vmatpush1.bf16.msra.mxu1 %v1617_v44 }
 0x1d2   :  { %1620 = vmatprep.subr.bf16.mxu1 %v1619_v47 }
 0x1d5   :  { %1622 = vmatpush1.bf16.msra.mxu1 %v1621_v56 }
 0x1d6   :  { %1624 = vmatprep.subr.bf16.mxu1 %v1623_v58  ;;  %v791_v58 = vpop.permute.xlu1 %790 }
 0x1d7   :  { %vm819_vm13 = vcmp.eq.s32.totalorder %v791_v58, 1 }
 0x23d   :  { %v1489_v43 = vpop.f32.mrb[0].mxu1 }
 0x23e   :  { %v641_v45 = vadd.f32 %v1489_v43, %v2211_v39  ;;  %v635_v46 = vpop.f32.mrb[1].mxu1 }
 0x23f   :  { %v636_v50 = vadd.f32 %v2211_v39, %v635_v46 }
 0x240   :  { %v715_v54 = vmax.f32 %v641_v45, 0.0 }
 0x241   :  { %v714_v55 = vmax.f32 %v636_v50, 0.0 }
 0x242   :  { %v827_v57 = vsel %vm811_vm1, %v715_v54, -inf  ;;  %vm929_vm1 = vcmask 1044484  }
 0x243   :  { %v826_v59 = vsel %vm810_vm3, %v714_v55, -inf  ;;  %v844_v60 = vsel %vm842_vm2, %v827_v57, -inf }
 0x244   :  { %v843_v61 = vsel %vm842_vm2, %v826_v59, -inf }
 0x245   :  { %v845_v62 = vmax.f32 %v843_v61, %v844_v60  ;;  %v1492_v63 = vpop.f32.mrb[2].mxu1 }
 0x246   :  { %v651_v2 = vadd.f32 %v1492_v63, %v2211_v39  ;;  %v645_v3 = vpop.f32.mrb[3].mxu1 }
 0x247   :  { %v846_v4 = vrot.slane %v845_v62, 4  ;;  %v646_v14 = vadd.f32 %v2211_v39, %v645_v3 }
 0x248   :  { %v717_v5 = vmax.f32 %v651_v2, 0.0 }
 0x249   :  { %v847_v13 = vmax.f32 %v845_v62, %v846_v4  ;;  %v716_v21 = vmax.f32 %v646_v14, 0.0  ;;  %v788_v62 = vpop.permute.xlu0 %787 }
 0x24a   :  { %v829_v6 = vsel %vm813_vm4, %v717_v5, -inf  ;;  %vm818_vm12 = vcmp.eq.s32.totalorder %v788_v62, 1 }
 0x24b   :  { %v853_v7 = vsel %vm842_vm2, %v829_v6, -inf  ;;  %v828_v10 = vsel %vm812_vm5, %v716_v21, -inf  ;;  %v848_v12 = vrot.slane %v847_v13, 2  ;;  %vm931_vm5 = vcmask 1045509  }
 0x24c   :  { %v852_v11 = vsel %vm842_vm2, %v828_v10, -inf }
 0x24d   :  { %v854_v15 = vmax.f32 %v852_v11, %v853_v7  ;;  %v1495_v16 = vpop.f32.mrb[4].mxu1  ;;  %v849_v25 = vmax.f32 %v847_v13, %v848_v12 }
 0x24e   :  { %v661_v18 = vadd.f32 %v1495_v16, %v2211_v39  ;;  %v655_v19 = vpop.f32.mrb[5].mxu1  ;;  %v797_v16 = vpop.permute.xlu1 %796 }
 0x24f   :  { %v855_v20 = vrot.slane %v854_v15, 4  ;;  %v656_v23 = vadd.f32 %v2211_v39, %v655_v19  ;;  %v850_v34 = vrot.slane %v849_v25, 1  ;;  %vm821_vm15 = vcmp.eq.s32.totalorder %v797_v16, 1 }
 0x250   :  { %v719_v24 = vmax.f32 %v661_v18, 0.0 }
 0x251   :  { %v856_v26 = vmax.f32 %v854_v15, %v855_v20  ;;  %v718_v27 = vmax.f32 %v656_v23, 0.0  ;;  %v851_v45 = vmax.f32 %v849_v25, %v850_v34  ;;  %v794_v25 = vpop.permute.xlu0 %793 }
 0x252   :  { %v831_v28 = vsel %vm815_vm7, %v719_v24, -inf  ;;  %vm820_vm0 = vcmp.eq.s32.totalorder %v794_v25, 1  ;;  %v1092_v25 = vld [vmem:[%s2406_s10 + $0x1d0] sm:$0xff] }
 0x253   :  { %v857_v29 = vrot.slane %v856_v26, 2  ;;  %v862_v30 = vsel %vm842_vm2, %v831_v28, -inf  ;;  %v830_v31 = vsel %vm814_vm6, %v718_v27, -inf }
 0x254   :  { %v861_v32 = vsel %vm842_vm2, %v830_v31, -inf }
 0x255   :  { %v858_v35 = vmax.f32 %v856_v26, %v857_v29  ;;  %v863_v36 = vmax.f32 %v861_v32, %v862_v30  ;;  %v1498_v0 = vpop.f32.mrb[6].mxu1 }
 0x256   :  { %v671_v37 = vadd.f32 %v1498_v0, %v2211_v39  ;;  %v665_v38 = vpop.f32.mrb[7].mxu1  ;;  %v803_v0 = vpop.permute.xlu1 %802 }
 0x257   :  { %v859_v40 = vrot.slane %v858_v35, 1  ;;  %v864_v41 = vrot.slane %v863_v36, 4  ;;  %v666_v43 = vadd.f32 %v2211_v39, %v665_v38  ;;  %vm823_vm3 = vcmp.eq.s32.totalorder %v803_v0, 1  ;;  %v1184_v0 = vld [vmem:[%s2409_s12 + $0x8] sm:$0xff] }
 0x258   :  { %v721_v44 = vmax.f32 %v671_v37, 0.0 }
 0x259   :  { %v860_v46 = vmax.f32 %v858_v35, %v859_v40  ;;  %v865_v47 = vmax.f32 %v863_v36, %v864_v41  ;;  %v720_v48 = vmax.f32 %v666_v43, 0.0 }
 0x25a   :  { %v833_v49 = vsel %vm817_vm8, %v721_v44, -inf  ;;  %v800_v44 = vpop.permute.xlu0 %799  ;;  %vm933_vm8 = vcmask 1046534  }
 0x25b   :  { %v924_v50 = vsel %vm923_vm9, %v860_v46, %v851_v45  ;;  %v866_v51 = vrot.slane %v865_v47, 2  ;;  %v871_v52 = vsel %vm842_vm2, %v833_v49, -inf  ;;  %v832_v53 = vsel %vm816_vm10, %v720_v48, -inf }
 0x25c   :  { %v870_v54 = vsel %vm842_vm2, %v832_v53, -inf  ;;  %vm822_vm4 = vcmp.eq.s32.totalorder %v800_v44, 1  ;;  %vm935_vm9 = vcmask 1047559   ;;  %v1203_v44 = vld [vmem:[%s2409_s12 + $0xa0] sm:$0xff] }
 0x25d   :  { %v867_v55 = vmax.f32 %v865_v47, %v866_v51  ;;  %v872_v56 = vmax.f32 %v870_v54, %v871_v52  ;;  %v1501_v57 = vpop.f32.mrb[8].mxu1 }
 0x25e   :  { %v681_v59 = vadd.f32 %v1501_v57, %v2211_v39  ;;  %v675_v60 = vpop.f32.mrb[9].mxu1  ;;  %v809_v57 = vpop.permute.xlu1 %808 }
 0x25f   :  { %v868_v61 = vrot.slane %v867_v55, 1  ;;  %v873_v63 = vrot.slane %v872_v56, 4  ;;  %v676_v1 = vadd.f32 %v2211_v39, %v675_v60  ;;  %v806_v60 = vpop.permute.xlu0 %805  ;;  %vm825_vm6 = vcmp.eq.s32.totalorder %v809_v57, 1  ;;  %v1208_v57 = vld [vmem:[%s2409_s12 + $0xc8] sm:$0xff] }
 0x260   :  { %v723_v2 = vmax.f32 %v681_v59, 0.0  ;;  %vm824_vm7 = vcmp.eq.s32.totalorder %v806_v60, 1  ;;  %v1191_v60 = vld [vmem:[%s2409_s12 + $0x40] sm:$0xff] }
 0x261   :  { %v869_v3 = vmax.f32 %v867_v55, %v868_v61  ;;  %v874_v4 = vmax.f32 %v872_v56, %v873_v63  ;;  %v722_v14 = vmax.f32 %v676_v1, 0.0 }
 0x262   :  { %v835_v5 = vsel %vm819_vm13, %v723_v2, -inf }
 0x263   :  { %v926_v13 = vsel %vm925_vm11, %v869_v3, %v924_v50  ;;  %v875_v21 = vrot.slane %v874_v4, 2  ;;  %v880_v6 = vsel %vm842_vm2, %v835_v5, -inf  ;;  %v834_v7 = vsel %vm818_vm12, %v722_v14, -inf }
 0x264   :  { %v879_v10 = vsel %vm842_vm2, %v834_v7, -inf }
 0x265   :  { %v876_v11 = vmax.f32 %v874_v4, %v875_v21  ;;  %v881_v12 = vmax.f32 %v879_v10, %v880_v6  ;;  %v1504_v15 = vpop.f32.mrb[10].mxu1 }
 0x266   :  { %v691_v17 = vadd.f32 %v1504_v15, %v2211_v39  ;;  %v685_v18 = vpop.f32.mrb[11].mxu1 }
 0x267   :  { %v877_v19 = vrot.slane %v876_v11, 1  ;;  %v882_v20 = vrot.slane %v881_v12, 4  ;;  %v686_v22 = vadd.f32 %v2211_v39, %v685_v18 }
 0x268   :  { %v725_v23 = vmax.f32 %v691_v17, 0.0 }
 0x269   :  { %v878_v24 = vmax.f32 %v876_v11, %v877_v19  ;;  %v883_v26 = vmax.f32 %v881_v12, %v882_v20  ;;  %v724_v27 = vmax.f32 %v686_v22, 0.0 }
 0x26a   :  { %v837_v28 = vsel %vm821_vm15, %v725_v23, -inf }
 0x26b   :  { %v928_v29 = vsel %vm927_vm14, %v878_v24, %v926_v13  ;;  %v884_v30 = vrot.slane %v883_v26, 2  ;;  %v889_v31 = vsel %vm842_vm2, %v837_v28, -inf  ;;  %v836_v32 = vsel %vm820_vm0, %v724_v27, -inf  ;;  %v1090_v24 = vld [vmem:[%s2406_s10 + $0x1c0] sm:$0xff]  ;;  %v1095_v27 = vld [vmem:[%s2406_s10 + $0x1e8] sm:$0xff]  ;;  %v1097_v28 = vld [vmem:[%s2406_s10 + $0x1f8] sm:$0xff] }
 0x26c   :  { %v888_v33 = vsel %vm842_vm2, %v836_v32, -inf }
 0x26d   :  { %v885_v34 = vmax.f32 %v883_v26, %v884_v30  ;;  %v890_v35 = vmax.f32 %v888_v33, %v889_v31  ;;  %v1507_v36 = vpop.f32.mrb[12].mxu1  ;;  %v1625_v26 = vpack.c.bf16 %v1092_v25, %v1090_v24  ;;  %v1094_v30 = vld [vmem:[%s2406_s10 + $0x1e0] sm:$0xff]  ;;  %v1096_v31 = vld [vmem:[%s2406_s10 + $0x1f0] sm:$0xff] }
 0x26e   :  { %v701_v37 = vadd.f32 %v1507_v36, %v2211_v39  ;;  %v695_v38 = vpop.f32.mrb[13].mxu1  ;;  %v1629_v32 = vpack.c.bf16 %v1096_v31, %v1094_v30  ;;  %v1199_v33 = vld [vmem:[%s2409_s12 + $0x80] sm:$0xff]  ;;  %v1197_v25 = vld [vmem:[%s2409_s12 + $0x70] sm:$0xff] }
 0x26f   :  { %v886_v40 = vrot.slane %v885_v34, 1  ;;  %v891_v41 = vrot.slane %v890_v35, 4  ;;  %v696_v42 = vadd.f32 %v2211_v39, %v695_v38  ;;  %1626 = vmatpush1.bf16.msra.mxu1 %v1625_v26  ;;  %v1202_v38 = vld [vmem:[%s2409_s12 + $0x98] sm:$0xff] }
 0x270   :  { %v727_v43 = vmax.f32 %v701_v37, 0.0  ;;  %v1201_v37 = vld [vmem:[%s2409_s12 + $0x90] sm:$0xff]  ;;  %v1198_v26 = vld [vmem:[%s2409_s12 + $0x78] sm:$0xff] }
 0x271   :  { %v887_v45 = vmax.f32 %v885_v34, %v886_v40  ;;  %v892_v46 = vmax.f32 %v890_v35, %v891_v41  ;;  %v726_v47 = vmax.f32 %v696_v42, 0.0  ;;  %v1200_v34 = vld [vmem:[%s2409_s12 + $0x88] sm:$0xff]  ;;  %v1183_v35 = vld [vmem:[%s2409_s12] sm:$0xff]  ;;  %v1635_v41 = vpack.c.bf16 %v1202_v38, %v1201_v37  ;;  %v1185_v42 = vld [vmem:[%s2409_s12 + $0x10] sm:$0xff] }
 0x272   :  { %v839_v48 = vsel %vm823_vm3, %v727_v43, -inf  ;;  %v1631_v36 = vpack.c.bf16 %v1200_v34, %v1199_v33  ;;  %v1633_v40 = vpack.c.bf16 %v1184_v0, %v1183_v35  ;;  %v1186_v43 = vld [vmem:[%s2409_s12 + $0x18] sm:$0xff]  ;;  %v1323_v37 = vld [vmem:[%s2412_s13] ss:$0 sm:$0xff] }
 0x273   :  { %v893_v49 = vrot.slane %v892_v46, 2  ;;  %v898_v50 = vsel %vm842_vm2, %v839_v48, -inf  ;;  %v838_v51 = vsel %vm822_vm4, %v726_v47, -inf  ;;  %v930_v52 = vsel %vm929_vm1, %v887_v45, %v928_v29  ;;  %v1204_v45 = vld [vmem:[%s2409_s12 + $0xa8] sm:$0xff]  ;;  %v1187_v48 = vld [vmem:[%s2409_s12 + $0x20] sm:$0xff] }
 0x274   :  { %v897_v53 = vsel %vm842_vm2, %v838_v51, -inf  ;;  %v1627_v29 = vpack.c.bf16 %v1097_v28, %v1095_v27  ;;  %1632 = vmatprep.subr.bf16.mxu0 %v1631_v36  ;;  %v1639_v47 = vpack.c.bf16 %v1204_v45, %v1203_v44  ;;  %v1206_v51 = vld [vmem:[%s2409_s12 + $0xb8] sm:$0xff]  ;;  %v1661_v27 = vpack.c.bf16 %v1198_v26, %v1197_v25  ;;  %v1098_v28 = vld [vmem:[%s2411_s11] sm:$0x3] }
 0x275   :  { %v894_v54 = vmax.f32 %v892_v46, %v893_v49  ;;  %v899_v55 = vmax.f32 %v897_v53, %v898_v50  ;;  %v1510_v56 = vpop.f32.mrb[14].mxu1  ;;  %v1637_v46 = vpack.c.bf16 %v1186_v43, %v1185_v42  ;;  %v1188_v49 = vld [vmem:[%s2409_s12 + $0x28] sm:$0xff]  ;;  %v1205_v50 = vld [vmem:[%s2409_s12 + $0xb0] sm:$0xff]  ;;  %v1107_v30 = vrot.slane %v1098_v28, %v1911_v9 }
 0x276   :  { %v711_v58 = vadd.f32 %v1510_v56, %v2211_v39  ;;  %v705_v59 = vpop.f32.mrb[15].mxu1  ;;  %1628 = vmatprep.subr.bf16.mxu1 %v1627_v29  ;;  %v1643_v53 = vpack.c.bf16 %v1206_v51, %v1205_v50  ;;  %v1207_v56 = vld [vmem:[%s2409_s12 + $0xc0] sm:$0xff]  ;;  %v1103_v29 = vrot.slane %v1098_v28, %v1909_v8 }
 0x277   :  { %v895_v61 = vrot.slane %v894_v54, 1  ;;  %v900_v62 = vrot.slane %v899_v55, 4  ;;  %v706_v63 = vadd.f32 %v2211_v39, %v705_v59  ;;  %1630 = vmatpush1.bf16.msra.mxu1 %v1629_v32  ;;  %v1647_v59 = vpack.c.bf16 %v1208_v57, %v1207_v56 }
 0x278   :  { %v729_v1 = vmax.f32 %v711_v58, 0.0 }
 0x279   :  { %v896_v2 = vmax.f32 %v894_v54, %v895_v61  ;;  %v901_v3 = vmax.f32 %v899_v55, %v900_v62  ;;  %v728_v4 = vmax.f32 %v706_v63, 0.0  ;;  %v1189_v54 = vld [vmem:[%s2409_s12 + $0x30] sm:$0xff]  ;;  %v1190_v55 = vld [vmem:[%s2409_s12 + $0x38] sm:$0xff]  ;;  %v1192_v61 = vld [vmem:[%s2409_s12 + $0x48] sm:$0xff] }
 0x27a   :  { %v841_v14 = vsel %vm825_vm6, %v729_v1, -inf  ;;  %v1645_v58 = vpack.c.bf16 %v1190_v55, %v1189_v54  ;;  %v1209_v62 = vld [vmem:[%s2409_s12 + $0xd0] sm:$0xff]  ;;  %v1210_v63 = vld [vmem:[%s2409_s12 + $0xd8] sm:$0xff]  ;;  %v1649_v1 = vpack.c.bf16 %v1192_v61, %v1191_v60 }
 0x27b   :  { %v902_v5 = vrot.slane %v901_v3, 2  ;;  %v907_v13 = vsel %vm842_vm2, %v841_v14, -inf  ;;  %v840_v21 = vsel %vm824_vm7, %v728_v4, -inf  ;;  %v932_v6 = vsel %vm931_vm5, %v896_v2, %v930_v52  ;;  %v1194_v4 = vld [vmem:[%s2409_s12 + $0x58] sm:$0xff]  ;;  %v1211_v14 = vld [vmem:[%s2409_s12 + $0xe0] sm:$0xff] }
 0x27c   :  { %v906_v7 = vsel %vm842_vm2, %v840_v21, -inf  ;;  %v1641_v52 = vpack.c.bf16 %v1188_v49, %v1187_v48  ;;  %v1651_v2 = vpack.c.bf16 %v1210_v63, %v1209_v62 }
 0x27d   :  { %v903_v10 = vmax.f32 %v901_v3, %v902_v5  ;;  %v908_v11 = vmax.f32 %v906_v7, %v907_v13  ;;  %v1193_v3 = vld [vmem:[%s2409_s12 + $0x50] sm:$0xff]  ;;  %v1212_v5 = vld [vmem:[%s2409_s12 + $0xe8] sm:$0xff] }
 0x27e   :  { %v1653_v13 = vpack.c.bf16 %v1194_v4, %v1193_v3  ;;  %v1655_v21 = vpack.c.bf16 %v1212_v5, %v1211_v14 }
 0x27f   :  { %v904_v12 = vrot.slane %v903_v10, 1  ;;  %v909_v15 = vrot.slane %v908_v11, 4 }
 0x281   :  { %v905_v39 = vmax.f32 %v903_v10, %v904_v12  ;;  %v910_v16 = vmax.f32 %v908_v11, %v909_v15 }
 0x283   :  { %v911_v17 = vrot.slane %v910_v16, 2  ;;  %v934_v18 = vsel %vm933_vm8, %v905_v39, %v932_v6  ;;  %v947_v6 = vld [vmem:[%s2410_s9] sm:$0x3] }
 0x284   :  { %v952_v7 = vrot.slane %v947_v6, %v1909_v8  ;;  %v956_v10 = vrot.slane %v947_v6, %v1911_v9 }
 0x285   :  { %v912_v19 = vmax.f32 %v910_v16, %v911_v17 }
 0x287   :  { %v913_v20 = vrot.slane %v912_v19, 1 }
 0x289   :  { %v914_v22 = vmax.f32 %v912_v19, %v913_v20  ;;  %v1196_v19 = vld [vmem:[%s2409_s12 + $0x68] sm:$0xff] }
 0x28b   :  { %v936_v23 = vsel %vm935_vm9, %v914_v22, %v934_v18  ;;  %v1195_v18 = vld [vmem:[%s2409_s12 + $0x60] sm:$0xff]  ;;  %v1213_v22 = vld [vmem:[%s2409_s12 + $0xf0] sm:$0xff] }
 0x28c   :  { %938 = vst.msk [vmem:[%s2408_s14] sm:$0xff] %vm842_vm2, %v936_v23  ;;  %1322 = vmatmul.mubr.msk.f32.vlgmr.msra.gmra.mrb[16].mxu0 %vm842_vm2, %v936_v23  ;;  %v1657_v20 = vpack.c.bf16 %v1196_v19, %v1195_v18  ;;  %v1214_v23 = vld [vmem:[%s2409_s12 + $0xf8] sm:$0xff]  ;;  %vm1293_vm2 = vcmask 130048  }
 0x28d   :  { %1634 = vmatpush3.bf16.msra.mxu0 %v1633_v40  ;;  %v1659_v24 = vpack.c.bf16 %v1214_v23, %v1213_v22 }
 0x28e   :  { %1636 = vmatprep.subr.bf16.mxu0 %v1635_v41 }
 0x291   :  { %1638 = vmatpush3.bf16.msra.mxu0 %v1637_v46 }
 0x292   :  { %1640 = vmatprep.subr.bf16.mxu0 %v1639_v47 }
 0x295   :  { %1642 = vmatpush3.bf16.msra.mxu0 %v1641_v52 }
 0x296   :  { %1644 = vmatprep.subr.bf16.mxu0 %v1643_v53 }
 0x299   :  { %1646 = vmatpush3.bf16.msra.mxu0 %v1645_v58 }
 0x29a   :  { %1648 = vmatprep.subr.bf16.mxu0 %v1647_v59 }
 0x29d   :  { %1650 = vmatpush3.bf16.msra.mxu0 %v1649_v1 }
 0x29e   :  { %1652 = vmatprep.subr.bf16.mxu0 %v1651_v2 }
 0x2a1   :  { %1654 = vmatpush3.bf16.msra.mxu0 %v1653_v13 }
 0x2a2   :  { %1656 = vmatprep.subr.bf16.mxu0 %v1655_v21 }
 0x2a5   :  { %1658 = vmatpush3.bf16.msra.mxu0 %v1657_v20 }
 0x2a6   :  { %1660 = vmatprep.subr.bf16.mxu0 %v1659_v24 }
 0x2a9   :  { %1662 = vmatpush3.bf16.msra.mxu0 %v1661_v27 }
 0x35f   :  { %v1027_v11 = vpop.f32.mrb[16].mxu0 }
 0x360   :  { %v1028_v12 = vadd.f32 %v1027_v11, %v952_v7  ;;  %v1029_v15 = vpop.f32.mrb[17].mxu0 }
 0x361   :  { %v1030_v39 = vadd.f32 %v1029_v15, %v956_v10 }
 0x362   :  { %v1032_v17 = vmax.f32 %v1028_v12, 0.0 }
 0x363   :  { %v1033_v16 = vmax.f32 %v1030_v39, 0.0 }
 0x365   :  { %1174 = vmatprep.mubr.f32.mxu1 %v1033_v16 }
 0x366   :  { %1175 = vmatmul.mubr.f32.vlgmr.msra.gmra.mrb[16].mxu1 %v1032_v17 }
 0x439   :  { %v1176_v31 = vpop.f32.mrb[16].mxu1 }
 0x43a   :  { %v1177_v32 = vadd.f32 %v1176_v31, %v1103_v29  ;;  %v1178_v33 = vpop.f32.mrb[17].mxu1 }
 0x43b   :  { %v1179_v34 = vadd.f32 %v1178_v33, %v1107_v30 }
 0x43c   :  { %v1181_v36 = vmax.f32 %v1177_v32, 0.0 }
 0x43d   :  { %v1182_v35 = vmax.f32 %v1179_v34, 0.0 }
 0x43f   :  { %1286 = vmatprep.mubr.f32.mxu0 %v1182_v35 }
 0x440   :  { %1287 = vmatmul.mubr.f32.vlgmr.msra.gmra.mrb[18].mxu0 %v1181_v36 }
 0x513   :  { %v1412_v0 = vpop.f32.mrb[18].mxu0 }
 0x514   :  { %v1413_v38 = vpop.f32.mrb[19].mxu0 }
 0x515   :  { %v1414_v40 = vadd.f32 %v1413_v38, %v1412_v0 }
 0x517   :  { %v1289_v41 = vadd.f32 %v1414_v40, %v1323_v37 }
 0x519   :  { %v1292_v8 = vmax.f32 %v1289_v41, 0.0 }
 0x51b   :  { %1294 = vst.msk [vmem:[%s2413_s15] sm:$0xff] %vm1293_vm2, %v1292_v8 }

</bundles_post_ra>
